<compile_context>
chip_gen: v7x
topology: tpu7x:2x2x1
jax: 0.10.0
libtpu: 0.0.40
codegen_flags: <defaults>
</compile_context>

<pallas_src>
import functools
import math

import jax
import jax.numpy as jnp
from jax import lax
from jax.experimental import pallas as pl
from jax.experimental.pallas import tpu as pltpu


def _mha_kernel(q_ref, k_ref, v_ref, wq_ref, wk_ref, wv_ref, wo_ref, b_ref,
                o_ref, kh_ref, vh_ref, *, nhead, head_dim, scale, compute_dtype):
    # ---- Per-batch projected K/V cache: fill on the first query tile only. ----
    @pl.when(pl.program_id(1) == 0)
    def _():
        kh = jnp.dot(k_ref[...], wk_ref[...],
                     preferred_element_type=jnp.float32) + b_ref[1:2, :]
        vh = jnp.dot(v_ref[...], wv_ref[...],
                     preferred_element_type=jnp.float32) + b_ref[2:3, :]
        kh_ref[...] = kh.astype(compute_dtype)
        vh_ref[...] = vh.astype(compute_dtype)

    # ---- Q projection for this tile; fold the 1/sqrt(hd) scale in here. ----
    qh = jnp.dot(q_ref[...], wq_ref[...],
                 preferred_element_type=jnp.float32) + b_ref[0:1, :]
    qh = (qh * scale).astype(compute_dtype)                       # (TQ, D)

    # ---- Per-head attention + fused output projection (static unroll). ----
    acc = None
    for h in range(nhead):
        lo = h * head_dim
        hi = lo + head_dim
        q_h = qh[:, lo:hi]                                        # (TQ, hd)
        k_h = kh_ref[:, lo:hi]                                    # (S,  hd)
        v_h = vh_ref[:, lo:hi]                                    # (S,  hd)

        # scores = q_h @ k_h.T with the transpose folded into the MXU op.
        s = lax.dot_general(q_h, k_h, (((1,), (1,)), ((), ())),
                            preferred_element_type=jnp.float32)   # (TQ, S)
        # Max-stabilized softmax in f32; normalization deferred to a single
        # EUP approx-reciprocal applied to the (TQ, hd) context.
        s = s - jnp.max(s, axis=-1, keepdims=True)
        p = jnp.exp(s)
        denom = jnp.sum(p, axis=-1, keepdims=True)                # (TQ, 1)
        # TODO(synk): attention-weight dropout omitted (eval/inference forward).
        # TODO(synk): optional `mask` (masked_fill with -1e9) not implemented.
        ctx = jnp.dot(p.astype(compute_dtype), v_h,
                      preferred_element_type=jnp.float32)         # (TQ, hd)
        ctx = ctx * pl.reciprocal(denom, approx=True)

        part = jnp.dot(ctx.astype(compute_dtype), wo_ref[lo:hi, :],
                       preferred_element_type=jnp.float32)        # (TQ, D)
        acc = part if acc is None else acc + part

    o_ref[...] = (acc + b_ref[3:4, :]).astype(o_ref.dtype)


def multi_head_attention(query, key, value, params, nhead, *,
                         q_tile=256, compute_dtype=jnp.bfloat16):
    """query/key/value: (B, S, D).  params = (wq, bq, wk, bk, wv, bv, wo, bo)
    with weights (D, D) in (in, out) layout and biases (1, D)."""
    B, S, D = query.shape
    assert key.shape == (B, S, D) and value.shape == (B, S, D)
    assert D % nhead == 0
    hd = D // nhead
    # Lane-dense per-head slices + sublane alignment on the sequence axis.
    assert hd % 128 == 0, "head_dim must be a multiple of 128 for this kernel"
    assert S % 8 == 0, "seq length must be a multiple of 8"
    wq, bq, wk, bk, wv, bv, wo, bo = params

    out_dtype = query.dtype
    TQ = min(S, q_tile)
    TQ -= TQ % 8
    assert TQ > 0 and S % TQ == 0, "q_tile must evenly divide the sequence length"
    # TODO(synk): for very long sequences (S*D >~ 2M f32 elements, esp. on v7x's
    # 64 MiB VMEM) switch to a K-tiled flash-style online softmax instead of
    # keeping full-S K/V and (TQ, S) scores resident.

    scale = 1.0 / math.sqrt(hd)
    grid = (B, S // TQ)
    kernel = functools.partial(_mha_kernel, nhead=nhead, head_dim=hd,
                               scale=scale, compute_dtype=compute_dtype)

    # MXU-friendly operand dtypes; all accumulation stays f32 in-kernel.
    qx = query.astype(compute_dtype)
    kx = key.astype(compute_dtype)
    vx = value.astype(compute_dtype)
    wqx, wkx, wvx, wox = (w.astype(compute_dtype) for w in (wq, wk, wv, wo))
    # Pack the four (1, D) biases into one resident (4, D) f32 block.
    biases = jnp.concatenate(
        [b.reshape(1, D) for b in (bq, bk, bv, bo)], axis=0).astype(jnp.float32)

    cbytes = jnp.dtype(compute_dtype).itemsize
    # Explicit VMEM budget (double-buffered inputs/outputs + resident scratch).
    vmem_bytes = (
        2 * TQ * D * cbytes            # query tiles
        + 2 * 2 * S * D * cbytes       # key / value blocks (constant over q)
        + 2 * 4 * D * D * cbytes       # resident weight matrices
        + 2 * 8 * D * 4                # packed biases (sublane padded)
        + 2 * TQ * D * 4               # output tiles
        + 2 * S * D * cbytes           # projected K/V scratch
        + 4 * TQ * S * 4               # scores / softmax intermediates
    )
    vmem_limit = int(min(max(2 * vmem_bytes, 32 * 1024 * 1024),
                         50 * 1024 * 1024))

    cost = pl.CostEstimate(
        flops=8 * B * S * D * D + 4 * B * S * S * D,
        transcendentals=B * nhead * S * S,
        bytes_accessed=(3 * B * S * D + 4 * D * D) * cbytes
        + 4 * D * 4 + B * S * D * jnp.dtype(out_dtype).itemsize,
    )

    return pl.pallas_call(
        kernel,
        out_shape=jax.ShapeDtypeStruct((B, S, D), out_dtype),
        grid=grid,
        in_specs=[
            # query tile for this (batch, q-tile); batch dim squeezed away.
            pl.BlockSpec((None, TQ, D), lambda b, q: (b, q, 0)),
            # full K / V for this batch element; constant over q -> one DMA per batch.
            pl.BlockSpec((None, S, D), lambda b, q: (b, 0, 0)),
            pl.BlockSpec((None, S, D), lambda b, q: (b, 0, 0)),
            # VMEM-resident full weight matrices (constant index maps, sliced per head).
            pl.BlockSpec((D, D), lambda b, q: (0, 0)),   # Wq
            pl.BlockSpec((D, D), lambda b, q: (0, 0)),   # Wk
            pl.BlockSpec((D, D), lambda b, q: (0, 0)),   # Wv
            pl.BlockSpec((D, D), lambda b, q: (0, 0)),   # Wo
            # packed biases (bq, bk, bv, bo) as one resident block.
            pl.BlockSpec((4, D), lambda b, q: (0, 0)),
        ],
        out_specs=pl.BlockSpec((None, TQ, D), lambda b, q: (b, q, 0)),
        scratch_shapes=[pltpu.VMEM((S, D), compute_dtype),   # projected K cache
                        pltpu.VMEM((S, D), compute_dtype)],  # projected V cache
        compiler_params=pltpu.CompilerParams(
            # q axis must be "arbitrary": the K/V cache fill at q == 0 has to
            # precede later q-tiles of the same batch element.
            dimension_semantics=("parallel", "arbitrary"),
            vmem_limit_bytes=vmem_limit),
        cost_estimate=cost,
    )(qx, kx, vx, wqx, wkx, wvx, wox, biases)


def _ref_mha(query, key, value, wq, bq, wk, bk, wv, bv, wo, bo, nhead):
    """Pure-JAX f32 reference matching the PyTorch module (mask=None, eval)."""
    B, S, D = query.shape
    hd = D // nhead
    hi = jax.lax.Precision.HIGHEST

    def split_heads(x, w, b):
        y = jnp.einsum("bsd,de->bse", x, w, precision=hi) + b
        return y.reshape(B, S, nhead, hd).transpose(0, 2, 1, 3)

    q = split_heads(query, wq, bq)
    k = split_heads(key, wk, bk)
    v = split_heads(value, wv, bv)
    scores = jnp.einsum("bhqd,bhkd->bhqk", q, k, precision=hi) / math.sqrt(hd)
    attn = jax.nn.softmax(scores, axis=-1)
    ctx = jnp.einsum("bhqk,bhkd->bhqd", attn, v, precision=hi)
    ctx = ctx.transpose(0, 2, 1, 3).reshape(B, S, D)
    return jnp.einsum("bsd,de->bse", ctx, wo, precision=hi) + bo


if __name__ == "__main__":
    B, S, D, H = 2, 32, 256, 2          # head_dim = 128
    keys = jax.random.split(jax.random.PRNGKey(0), 11)
    std = 1.0 / math.sqrt(D)

    query = jax.random.normal(keys[0], (B, S, D), jnp.float32)
    key_in = jax.random.normal(keys[1], (B, S, D), jnp.float32)
    value = jax.random.normal(keys[2], (B, S, D), jnp.float32)

    wq = jax.random.normal(keys[3], (D, D), jnp.float32) * std
    wk = jax.random.normal(keys[4], (D, D), jnp.float32) * std
    wv = jax.random.normal(keys[5], (D, D), jnp.float32) * std
    wo = jax.random.normal(keys[6], (D, D), jnp.float32) * std
    bq = jax.random.normal(keys[7], (1, D), jnp.float32) * 0.02
    bk = jax.random.normal(keys[8], (1, D), jnp.float32) * 0.02
    bv = jax.random.normal(keys[9], (1, D), jnp.float32) * 0.02
    bo = jax.random.normal(keys[10], (1, D), jnp.float32) * 0.02

    params = (wq, bq, wk, bk, wv, bv, wo, bo)
    # q_tile=16 -> 2 q-tiles per batch element, exercising the per-batch
    # projected-K/V cache (filled at q == 0, reused on the second tile).
    out = multi_head_attention(query, key_in, value, params, H, q_tile=16)
    out = jax.block_until_ready(out)

    ref = _ref_mha(query, key_in, value, wq, bq, wk, bk, wv, bv, wo, bo, H)
    assert out.shape == (B, S, D)
    # bf16 MXU operands with f32 accumulation vs. a pure-f32 reference.
    max_err = float(jnp.max(jnp.abs(out - ref)))
    assert jnp.allclose(out, ref, atol=1e-1, rtol=1e-1), \
        f"mismatch vs reference (max_err={max_err})"

    print("KERNEL_OK")
</pallas_src>

<mosaic_0001>
module attributes {stable_mosaic.version = 11 : i64} {
  func.func @_mha_kernel(%arg0: i32, %arg1: i32, %arg2: memref<1x16x256xbf16, #tpu.memory_space<vmem>>, %arg3: memref<1x32x256xbf16, #tpu.memory_space<vmem>>, %arg4: memref<1x32x256xbf16, #tpu.memory_space<vmem>>, %arg5: memref<256x256xbf16, #tpu.memory_space<vmem>>, %arg6: memref<256x256xbf16, #tpu.memory_space<vmem>>, %arg7: memref<256x256xbf16, #tpu.memory_space<vmem>>, %arg8: memref<256x256xbf16, #tpu.memory_space<vmem>>, %arg9: memref<4x256xf32, #tpu.memory_space<vmem>>, %arg10: memref<1x16x256xf32, #tpu.memory_space<vmem>>, %arg11: memref<32x256xbf16, #tpu.memory_space<vmem>>, %arg12: memref<32x256xbf16, #tpu.memory_space<vmem>>) attributes {dimension_semantics = [#tpu.dimension_semantics<parallel>, #tpu.dimension_semantics<arbitrary>], iteration_bounds = array<i64: 2, 2>, scalar_prefetch = 0 : i64, scratch_operands = 2 : i64, tpu.core_type = #tpu.core_type<tc>, window_params = [{transform_indices = @transform_0, window_bounds = array<i64: 1, 16, 256>}, {transform_indices = @transform_1, window_bounds = array<i64: 1, 32, 256>}, {transform_indices = @transform_2, window_bounds = array<i64: 1, 32, 256>}, {pipeline_mode = #tpu.pipeline_mode<synchronous>, transform_indices = @transform_3, window_bounds = array<i64: 256, 256>}, {pipeline_mode = #tpu.pipeline_mode<synchronous>, transform_indices = @transform_4, window_bounds = array<i64: 256, 256>}, {pipeline_mode = #tpu.pipeline_mode<synchronous>, transform_indices = @transform_5, window_bounds = array<i64: 256, 256>}, {pipeline_mode = #tpu.pipeline_mode<synchronous>, transform_indices = @transform_6, window_bounds = array<i64: 256, 256>}, {pipeline_mode = #tpu.pipeline_mode<synchronous>, transform_indices = @transform_7, window_bounds = array<i64: 4, 256>}, {transform_indices = @transform_8, window_bounds = array<i64: 1, 16, 256>}]} {
    %c0_i32 = arith.constant 0 : i32
    %0 = arith.cmpi eq, %arg1, %c0_i32 : i32
    %1 = arith.extui %0 : i1 to i32
    %c0_i32_0 = arith.constant 0 : i32
    %2 = arith.cmpi ne, %1, %c0_i32_0 : i32
    scf.if %2 {
      %c0_33 = arith.constant 0 : index
      %c0_34 = arith.constant 0 : index
      %c0_35 = arith.constant 0 : index
      %58 = vector.load %arg3[%c0_33, %c0_34, %c0_35] : memref<1x32x256xbf16, #tpu.memory_space<vmem>>, vector<1x32x256xbf16>
      %59 = vector.shape_cast %58 : vector<1x32x256xbf16> to vector<32x256xbf16>
      %c0_36 = arith.constant 0 : index
      %c0_37 = arith.constant 0 : index
      %60 = vector.load %arg6[%c0_36, %c0_37] : memref<256x256xbf16, #tpu.memory_space<vmem>>, vector<256x256xbf16>
      %cst_38 = arith.constant dense<0.000000e+00> : vector<32x256xf32>
      %61 = tpu.matmul %59, %60, %cst_38 {dimension_numbers = #tpu.dot_dimension_numbers<[1], [0], [0], [1], [0, 0, 1, 1], [], []>} : vector<32x256xbf16>, vector<256x256xbf16>, vector<32x256xf32> -> vector<32x256xf32>
      %c1 = arith.constant 1 : index
      %c0_39 = arith.constant 0 : index
      %62 = vector.load %arg9[%c1, %c0_39] : memref<4x256xf32, #tpu.memory_space<vmem>>, vector<1x256xf32>
      %63 = vector.broadcast %62 : vector<1x256xf32> to vector<32x256xf32>
      %64 = arith.addf %61, %63 : vector<32x256xf32>
      %c0_40 = arith.constant 0 : index
      %c0_41 = arith.constant 0 : index
      %c0_42 = arith.constant 0 : index
      %65 = vector.load %arg4[%c0_40, %c0_41, %c0_42] : memref<1x32x256xbf16, #tpu.memory_space<vmem>>, vector<1x32x256xbf16>
      %66 = vector.shape_cast %65 : vector<1x32x256xbf16> to vector<32x256xbf16>
      %c0_43 = arith.constant 0 : index
      %c0_44 = arith.constant 0 : index
      %67 = vector.load %arg7[%c0_43, %c0_44] : memref<256x256xbf16, #tpu.memory_space<vmem>>, vector<256x256xbf16>
      %cst_45 = arith.constant dense<0.000000e+00> : vector<32x256xf32>
      %68 = tpu.matmul %66, %67, %cst_45 {dimension_numbers = #tpu.dot_dimension_numbers<[1], [0], [0], [1], [0, 0, 1, 1], [], []>} : vector<32x256xbf16>, vector<256x256xbf16>, vector<32x256xf32> -> vector<32x256xf32>
      %c2 = arith.constant 2 : index
      %c0_46 = arith.constant 0 : index
      %69 = vector.load %arg9[%c2, %c0_46] : memref<4x256xf32, #tpu.memory_space<vmem>>, vector<1x256xf32>
      %70 = vector.broadcast %69 : vector<1x256xf32> to vector<32x256xf32>
      %71 = arith.addf %68, %70 : vector<32x256xf32>
      %72 = arith.truncf %64 : vector<32x256xf32> to vector<32x256xbf16>
      %c0_47 = arith.constant 0 : index
      %c0_48 = arith.constant 0 : index
      %73 = vector.load %arg11[%c0_47, %c0_48] : memref<32x256xbf16, #tpu.memory_space<vmem>>, vector<32x256xbf16>
      tpu.vector_store %arg11[%c0_47, %c0_48], %72 {strides = array<i32>} : memref<32x256xbf16, #tpu.memory_space<vmem>>, vector<32x256xbf16>,
      %74 = arith.truncf %71 : vector<32x256xf32> to vector<32x256xbf16>
      %c0_49 = arith.constant 0 : index
      %c0_50 = arith.constant 0 : index
      %75 = vector.load %arg12[%c0_49, %c0_50] : memref<32x256xbf16, #tpu.memory_space<vmem>>, vector<32x256xbf16>
      tpu.vector_store %arg12[%c0_49, %c0_50], %74 {strides = array<i32>} : memref<32x256xbf16, #tpu.memory_space<vmem>>, vector<32x256xbf16>,
    } else {
    }
    %c0 = arith.constant 0 : index
    %c0_1 = arith.constant 0 : index
    %c0_2 = arith.constant 0 : index
    %3 = vector.load %arg2[%c0, %c0_1, %c0_2] : memref<1x16x256xbf16, #tpu.memory_space<vmem>>, vector<1x16x256xbf16>
    %4 = vector.shape_cast %3 : vector<1x16x256xbf16> to vector<16x256xbf16>
    %c0_3 = arith.constant 0 : index
    %c0_4 = arith.constant 0 : index
    %5 = vector.load %arg5[%c0_3, %c0_4] : memref<256x256xbf16, #tpu.memory_space<vmem>>, vector<256x256xbf16>
    %cst = arith.constant dense<0.000000e+00> : vector<16x256xf32>
    %6 = tpu.matmul %4, %5, %cst {dimension_numbers = #tpu.dot_dimension_numbers<[1], [0], [0], [1], [0, 0, 1, 1], [], []>} : vector<16x256xbf16>, vector<256x256xbf16>, vector<16x256xf32> -> vector<16x256xf32>
    %c0_5 = arith.constant 0 : index
    %c0_6 = arith.constant 0 : index
    %7 = vector.load %arg9[%c0_5, %c0_6] : memref<4x256xf32, #tpu.memory_space<vmem>>, vector<1x256xf32>
    %8 = vector.broadcast %7 : vector<1x256xf32> to vector<16x256xf32>
    %9 = arith.addf %6, %8 : vector<16x256xf32>
    %cst_7 = arith.constant 0.0883883461 : f32
    %10 = vector.broadcast %cst_7 : f32 to vector<16x256xf32>
    %11 = arith.mulf %9, %10 : vector<16x256xf32>
    %12 = arith.truncf %11 : vector<16x256xf32> to vector<16x256xbf16>
    %13 = vector.extract_strided_slice %12 {offsets = [0, 0], sizes = [16, 128], strides = [1, 1]} : vector<16x256xbf16> to vector<16x128xbf16>
    %c0_8 = arith.constant 0 : index
    %c0_9 = arith.constant 0 : index
    %14 = vector.load %arg11[%c0_8, %c0_9] : memref<32x256xbf16, #tpu.memory_space<vmem>>, vector<32x128xbf16>
    %c0_10 = arith.constant 0 : index
    %c0_11 = arith.constant 0 : index
    %15 = vector.load %arg12[%c0_10, %c0_11] : memref<32x256xbf16, #tpu.memory_space<vmem>>, vector<32x128xbf16>
    %cst_12 = arith.constant dense<0.000000e+00> : vector<16x32xf32>
    %16 = tpu.matmul %13, %14, %cst_12 {dimension_numbers = #tpu.dot_dimension_numbers<[1], [1], [0], [0], [0, 0, 1, 0], [], []>} : vector<16x128xbf16>, vector<32x128xbf16>, vector<16x32xf32> -> vector<16x32xf32>
    %cst_13 = arith.constant dense<0xFF800000> : vector<16xf32>
    %17 = vector.multi_reduction <maximumf>, %16, %cst_13 [1] : vector<16x32xf32> to vector<16xf32>
    %18 = vector.shape_cast %17 : vector<16xf32> to vector<16x1xf32>
    %19 = vector.broadcast %18 : vector<16x1xf32> to vector<16x32xf32>
    %20 = arith.subf %16, %19 : vector<16x32xf32>
    %21 = math.exp %20 : vector<16x32xf32>
    %cst_14 = arith.constant dense<0.000000e+00> : vector<16xf32>
    %22 = vector.multi_reduction <add>, %21, %cst_14 [1] : vector<16x32xf32> to vector<16xf32>
    %23 = vector.shape_cast %22 : vector<16xf32> to vector<16x1xf32>
    %24 = arith.truncf %21 : vector<16x32xf32> to vector<16x32xbf16>
    %cst_15 = arith.constant dense<0.000000e+00> : vector<16x128xf32>
    %25 = tpu.matmul %24, %15, %cst_15 {dimension_numbers = #tpu.dot_dimension_numbers<[1], [0], [0], [1], [0, 0, 1, 1], [], []>} : vector<16x32xbf16>, vector<32x128xbf16>, vector<16x128xf32> -> vector<16x128xf32>
    %26 = tpu.reciprocal %23 {approx = true} : vector<16x1xf32> -> vector<16x1xf32>
    %27 = vector.broadcast %26 : vector<16x1xf32> to vector<16x128xf32>
    %28 = arith.mulf %25, %27 : vector<16x128xf32>
    %29 = arith.truncf %28 : vector<16x128xf32> to vector<16x128xbf16>
    %c0_16 = arith.constant 0 : index
    %c0_17 = arith.constant 0 : index
    %30 = vector.load %arg8[%c0_16, %c0_17] : memref<256x256xbf16, #tpu.memory_space<vmem>>, vector<128x256xbf16>
    %cst_18 = arith.constant dense<0.000000e+00> : vector<16x256xf32>
    %31 = tpu.matmul %29, %30, %cst_18 {dimension_numbers = #tpu.dot_dimension_numbers<[1], [0], [0], [1], [0, 0, 1, 1], [], []>} : vector<16x128xbf16>, vector<128x256xbf16>, vector<16x256xf32> -> vector<16x256xf32>
    %32 = vector.extract_strided_slice %12 {offsets = [0, 128], sizes = [16, 128], strides = [1, 1]} : vector<16x256xbf16> to vector<16x128xbf16>
    %c0_19 = arith.constant 0 : index
    %c128 = arith.constant 128 : index
    %33 = vector.load %arg11[%c0_19, %c128] : memref<32x256xbf16, #tpu.memory_space<vmem>>, vector<32x128xbf16>
    %c0_20 = arith.constant 0 : index
    %c128_21 = arith.constant 128 : index
    %34 = vector.load %arg12[%c0_20, %c128_21] : memref<32x256xbf16, #tpu.memory_space<vmem>>, vector<32x128xbf16>
    %cst_22 = arith.constant dense<0.000000e+00> : vector<16x32xf32>
    %35 = tpu.matmul %32, %33, %cst_22 {dimension_numbers = #tpu.dot_dimension_numbers<[1], [1], [0], [0], [0, 0, 1, 0], [], []>} : vector<16x128xbf16>, vector<32x128xbf16>, vector<16x32xf32> -> vector<16x32xf32>
    %cst_23 = arith.constant dense<0xFF800000> : vector<16xf32>
    %36 = vector.multi_reduction <maximumf>, %35, %cst_23 [1] : vector<16x32xf32> to vector<16xf32>
    %37 = vector.shape_cast %36 : vector<16xf32> to vector<16x1xf32>
    %38 = vector.broadcast %37 : vector<16x1xf32> to vector<16x32xf32>
    %39 = arith.subf %35, %38 : vector<16x32xf32>
    %40 = math.exp %39 : vector<16x32xf32>
    %cst_24 = arith.constant dense<0.000000e+00> : vector<16xf32>
    %41 = vector.multi_reduction <add>, %40, %cst_24 [1] : vector<16x32xf32> to vector<16xf32>
    %42 = vector.shape_cast %41 : vector<16xf32> to vector<16x1xf32>
    %43 = arith.truncf %40 : vector<16x32xf32> to vector<16x32xbf16>
    %cst_25 = arith.constant dense<0.000000e+00> : vector<16x128xf32>
    %44 = tpu.matmul %43, %34, %cst_25 {dimension_numbers = #tpu.dot_dimension_numbers<[1], [0], [0], [1], [0, 0, 1, 1], [], []>} : vector<16x32xbf16>, vector<32x128xbf16>, vector<16x128xf32> -> vector<16x128xf32>
    %45 = tpu.reciprocal %42 {approx = true} : vector<16x1xf32> -> vector<16x1xf32>
    %46 = vector.broadcast %45 : vector<16x1xf32> to vector<16x128xf32>
    %47 = arith.mulf %44, %46 : vector<16x128xf32>
    %48 = arith.truncf %47 : vector<16x128xf32> to vector<16x128xbf16>
    %c128_26 = arith.constant 128 : index
    %c0_27 = arith.constant 0 : index
    %49 = vector.load %arg8[%c128_26, %c0_27] : memref<256x256xbf16, #tpu.memory_space<vmem>>, vector<128x256xbf16>
    %cst_28 = arith.constant dense<0.000000e+00> : vector<16x256xf32>
    %50 = tpu.matmul %48, %49, %cst_28 {dimension_numbers = #tpu.dot_dimension_numbers<[1], [0], [0], [1], [0, 0, 1, 1], [], []>} : vector<16x128xbf16>, vector<128x256xbf16>, vector<16x256xf32> -> vector<16x256xf32>
    %51 = arith.addf %31, %50 : vector<16x256xf32>
    %c3 = arith.constant 3 : index
    %c0_29 = arith.constant 0 : index
    %52 = vector.load %arg9[%c3, %c0_29] : memref<4x256xf32, #tpu.memory_space<vmem>>, vector<1x256xf32>
    %53 = vector.broadcast %52 : vector<1x256xf32> to vector<16x256xf32>
    %54 = arith.addf %51, %53 : vector<16x256xf32>
    %c0_30 = arith.constant 0 : index
    %c0_31 = arith.constant 0 : index
    %c0_32 = arith.constant 0 : index
    %55 = vector.load %arg10[%c0_30, %c0_31, %c0_32] : memref<1x16x256xf32, #tpu.memory_space<vmem>>, vector<1x16x256xf32>
    %56 = vector.shape_cast %55 : vector<1x16x256xf32> to vector<16x256xf32>
    %57 = vector.shape_cast %54 : vector<16x256xf32> to vector<1x16x256xf32>
    tpu.vector_store %arg10[%c0_30, %c0_31, %c0_32], %57 {strides = array<i32>} : memref<1x16x256xf32, #tpu.memory_space<vmem>>, vector<1x16x256xf32>,
    return
  }
  func.func @transform_0(%arg0: i32, %arg1: i32) -> (i32, i32, i32) {
    %c0_i32 = arith.constant 0 : i32
    %c0_i32_0 = arith.constant 0 : i32
    return %arg0, %arg1, %c0_i32 : i32, i32, i32
  }
  func.func @transform_1(%arg0: i32, %arg1: i32) -> (i32, i32, i32) {
    %c0_i32 = arith.constant 0 : i32
    %c0_i32_0 = arith.constant 0 : i32
    %c0_i32_1 = arith.constant 0 : i32
    return %arg0, %c0_i32, %c0_i32_0 : i32, i32, i32
  }
  func.func @transform_2(%arg0: i32, %arg1: i32) -> (i32, i32, i32) {
    %c0_i32 = arith.constant 0 : i32
    %c0_i32_0 = arith.constant 0 : i32
    %c0_i32_1 = arith.constant 0 : i32
    return %arg0, %c0_i32, %c0_i32_0 : i32, i32, i32
  }
  func.func @transform_3(%arg0: i32, %arg1: i32) -> (i32, i32) {
    %c0_i32 = arith.constant 0 : i32
    %c0_i32_0 = arith.constant 0 : i32
    %c0_i32_1 = arith.constant 0 : i32
    return %c0_i32, %c0_i32_0 : i32, i32
  }
  func.func @transform_4(%arg0: i32, %arg1: i32) -> (i32, i32) {
    %c0_i32 = arith.constant 0 : i32
    %c0_i32_0 = arith.constant 0 : i32
    %c0_i32_1 = arith.constant 0 : i32
    return %c0_i32, %c0_i32_0 : i32, i32
  }
  func.func @transform_5(%arg0: i32, %arg1: i32) -> (i32, i32) {
    %c0_i32 = arith.constant 0 : i32
    %c0_i32_0 = arith.constant 0 : i32
    %c0_i32_1 = arith.constant 0 : i32
    return %c0_i32, %c0_i32_0 : i32, i32
  }
  func.func @transform_6(%arg0: i32, %arg1: i32) -> (i32, i32) {
    %c0_i32 = arith.constant 0 : i32
    %c0_i32_0 = arith.constant 0 : i32
    %c0_i32_1 = arith.constant 0 : i32
    return %c0_i32, %c0_i32_0 : i32, i32
  }
  func.func @transform_7(%arg0: i32, %arg1: i32) -> (i32, i32) {
    %c0_i32 = arith.constant 0 : i32
    %c0_i32_0 = arith.constant 0 : i32
    %c0_i32_1 = arith.constant 0 : i32
    return %c0_i32, %c0_i32_0 : i32, i32
  }
  func.func @transform_8(%arg0: i32, %arg1: i32) -> (i32, i32, i32) {
    %c0_i32 = arith.constant 0 : i32
    %c0_i32_0 = arith.constant 0 : i32
    return %arg0, %arg1, %c0_i32 : i32, i32, i32
  }
}

</mosaic_0001>

<bundles_post_ra>
// kernel: tpu_custom_call.1
= control target key start
LH: loop header
LB: loop body
LE: loop exit
PB: predicated region body
PF: predicated region fallthrough
CT: control target
= control target key end

     0   :  { %s3602_s0 = inlined_call_operand.hbm [shape: bf16[2,32,256], index: 0, kind: input, shape index: {}]   ;;  %s3603_s1 = inlined_call_operand.hbm [shape: bf16[2,32,256], index: 1, kind: input, shape index: {}]   ;;  %s3604_s2 = inlined_call_operand.hbm [shape: bf16[2,32,256], index: 2, kind: input, shape index: {}]   ;;  %s3605_s3 = inlined_call_operand.hbm [shape: bf16[256,256], index: 3, kind: input, shape index: {}]   ;;  %s3606_s4 = inlined_call_operand.hbm [shape: bf16[256,256], index: 4, kind: input, shape index: {}]   ;;  %s3607_s5 = inlined_call_operand.hbm [shape: bf16[256,256], index: 5, kind: input, shape index: {}]   ;;  %s3608_s6 = inlined_call_operand.hbm [shape: bf16[256,256], index: 6, kind: input, shape index: {}]   ;;  %s3609_s7 = inlined_call_operand.vmem [shape: f32[4,256], index: 7, kind: input, shape index: {}]   ;;  %s3610_s8 = inlined_call_operand.hbm [shape: f32[2,32,256], index: 8, kind: output, shape index: {}]  }
   0x1   :  { %3642 = sst [smem:[#allocation32_spill]] %s3602_s0 }
   0x2   :  { %3643 = sst [smem:[#allocation33_spill]] %s3603_s1 }
   0x3   :  { %3644 = sst [smem:[#allocation34_spill]] %s3605_s3 }
   0x4   :  { %3645 = sst [smem:[#allocation35_spill]] %s3606_s4 }
   0x5   :  { %3646 = sst [smem:[#allocation36_spill]] %s3607_s5 }
   0x6   :  { %3647 = sst [smem:[#allocation37_spill]] %s3608_s6 }
   0x7   :  { %3648 = sst [smem:[#allocation38_spill]] %s3609_s7 }
   0x8   :  { %3649 = sst [smem:[#allocation39_spill]] %s3610_s8 }
   0x9   :  { %13 = vsyncpa [#allocation5], 0 }
   0xa   :  { %15 = vsyncpa [#allocation5 + $0x1], 0 }
   0xb   :  { %16 = vsyncpa [#allocation8], 0 }
   0xc   :  { %18 = vsyncpa [#allocation8 + $0x1], 0 }
   0xd   :  { %19 = vsyncpa [#allocation11], 0 }
   0xe   :  { %20 = vsyncpa [#allocation14], 0 }
   0xf   :  { %21 = vsyncpa [#allocation6], 0 }
  0x10   :  { %23 = vsyncpa [#allocation6 + $0x1], 0  ;;  %s3056_s27 = smov 0   ;;  %s3058_s28 = smov 0  }
  0x11   :  { %s3060_s29 = smov 0   ;;  %s3062_s30 = smov 0  }
  0x12   :  { %s3064_s9 = smov 0   ;;  %s3066_s10 = smov 0  }
  0x13   :  { %s3068_s11 = smov 0   ;;  %s3070_s12 = smov 0  }
  0x14   :  { %s3072_s13 = smov 0   ;;  %s3074_s14 = smov 0  }
  0x15   :  { %s3076_s15 = smov 0  }
  0x16 LB: > { %3650 = sst [smem:[#allocation22_spill]] %s2958_s28  ;;  %s3112_s16 = sadd.s32 4294967295, %s2994_s15   ;;  %s2994_s15 = sphi %s3076_s15, %s29_s15   ;;  %s2990_s14 = sphi %s3074_s14, %s3723_s14   ;;  %s2986_s13 = sphi %s3072_s13, %s3722_s13   ;;  %s2982_s12 = sphi %s3070_s12, %s3721_s12   ;;  %s2978_s11 = sphi %s3068_s11, %s3720_s11   ;;  %s2974_s10 = sphi %s3066_s10, %s3719_s10   ;;  %s2970_s9 = sphi %s3064_s9, %s3718_s9   ;;  %s2966_s30 = sphi %s3062_s30, %s3717_s30   ;;  %s2962_s29 = sphi %s3060_s29, %s3716_s29   ;;  %s2958_s28 = sphi %s3058_s28, %s3715_s28   ;;  %s2954_s27 = sphi %s3056_s27, %s3711_s27  }
  0x17   : > { %3651 = sst [smem:[#allocation23_spill]] %s2962_s29  ;;  %p2046_p0 = scmp.ge.s32.totalorder %s2994_s15, 1 }
  0x18   : > { %3652 = sst [smem:[#allocation24_spill]] %s2966_s30  ;;  %p3612_p1 = scmp.eq.s32.totalorder %s3112_s16, 0 }
  0x19   : > { %3653 = sst [smem:[#allocation25_spill]] %s2978_s11  ;;  %p259_p2 = scmp.lt.s32.totalorder %s2994_s15, 5 }
  0x1a   : > { %3654 = sst [smem:[#allocation26_spill]] %s2982_s12  ;;  %s2996_s18 = smov [#allocation10]  }
  0x1b   : > { %p3117_p3 = pnand %p2046_p0, %p259_p2  ;;  %s271_s19 = sshll.u32 %s2996_s18, 4  ;;  %s272_s19 = int_to_ptr.vmem [resolvable:$true] %s271_s19 }
  0x1c   : > { %s2997_s21 = smov [#allocation13]   ;;  %s3658_s3 = sld [smem:[#allocation34_spill]] }
  0x1d   : > { %s3655_s17 = scalar_select %p3117_p3, 1, 0 }
  0x1e   : > { %p2299_p4 = pneg %p3117_p3  ;;  %s297_s22 = sshll.u32 %s2997_s21, 4  ;;  %s3129_s22 = int_to_ptr.vmem [resolvable:$true] %s297_s22 }
  0x1f   : > { %3656 = sst [smem:[#allocation27_spill]] %s3655_s17 }
  0x20   : > { %p3125_p5 = pnand %p2299_p4, %p3612_p1 }
  0x22   : > { %s3657_s20 = scalar_select %p3125_p5, 1, 0 }
  0x23   : > { %s2658_s25 = scalar_lea.hbm %s3658_s3, 4096  ;;  %p3139_p7 = pneg %p3125_p5 }
  0x24   : > { %p2659_p6 = scmp.ne.s32.totalorder %s3658_s3, %s2658_s25  ;;  %p2665_p10 = scmp.lt.u32.totalorder %s2658_s25, %s3658_s3 }
  0x26   : > { %p2661_p8 = pnand %p3139_p7, %p2659_p6 }
  0x28   : > { %p2662_p9 = pneg %p2661_p8 }
  0x2a   : > { %p2667_p11 = pnand %p2665_p10, %p2662_p9 }
  0x2c   : > { %2670 = shalt.err (!%p2667_p11)
}
  0x2d   : > { %s2671_s23 = scalar_lea.vmem %s272_s19, 4096  ;;  %p2679_p2 = scmp.lt.s32.totalorder %s272_s19, %s272_s19 }
  0x2e   : > { %p2672_p12 = scmp.ne.s32.totalorder %s272_s19, %s2671_s23  ;;  %p2680_p4 = scmp.lt.s32.totalorder %s2671_s23, %s2671_s23 }
  0x30   : > { %p2674_p13 = pnand %p2672_p12, %p3139_p7  ;;  %p2681_p1 = por %p2680_p4, %p2679_p2 }
  0x32   : > { %p2675_p0 = pneg %p2674_p13 }
  0x34   : > { %p2682_p3 = pnand %p2681_p1, %p2675_p0 }
  0x36   : > { %2685 = shalt.err (!%p2682_p3)
}
  0x37   : > { %s3619_s8 = smov 128   ;;  %s3621_s24 = smov 8  }
  0x38   : > { %2302 = dma.hbm_to_vmem [thread:$0]  (!%p3125_p5), %s3658_s3, 4096, %s272_s19, [#allocation11], %s3619_s8, %s3619_s8, %s3621_s24  }
  0x39   : > { %s3660_s5 = sld [smem:[#allocation36_spill]] }
  0x3f   : > { %s2686_s7 = scalar_lea.hbm %s3660_s5, 4096 }
  0x40   : > { %p2687_p1 = scmp.ne.s32.totalorder %s3660_s5, %s2686_s7  ;;  %p2693_p8 = scmp.lt.u32.totalorder %s2686_s7, %s3660_s5 }
  0x42   : > { %p2689_p3 = pnand %p2687_p1, %p3139_p7 }
  0x44   : > { %p2690_p6 = pneg %p2689_p3 }
  0x46   : > { %p2695_p9 = pnand %p2693_p8, %p2690_p6 }
  0x48   : > { %2698 = shalt.err (!%p2695_p9)
}
  0x49   : > { %s2699_s19 = scalar_lea.vmem %s3129_s22, 4096  ;;  %p2707_p13 = scmp.lt.s32.totalorder %s3129_s22, %s3129_s22 }
  0x4a   : > { %p2700_p10 = scmp.ne.s32.totalorder %s3129_s22, %s2699_s19  ;;  %p2708_p0 = scmp.lt.s32.totalorder %s2699_s19, %s2699_s19 }
  0x4c   : > { %p2702_p11 = pnand %p2700_p10, %p3139_p7  ;;  %p2709_p2 = por %p2708_p0, %p2707_p13 }
  0x4e   : > { %p2703_p12 = pneg %p2702_p11 }
  0x50   : > { %p2710_p4 = pnand %p2709_p2, %p2703_p12 }
  0x52   : > { %2713 = shalt.err (!%p2710_p4)
}
  0x53   : > { %2308 = dma.hbm_to_vmem [thread:$0]  (!%p3125_p5), %s3660_s5, 4096, %s3129_s22, [#allocation14], %s3619_s8, %s3619_s8, %s3621_s24  }
  0x54   : > { %p3624_p3 = scmp.eq.s32.totalorder %s2994_s15, 0  ;;  %p83_p6 = scmp.ne.s32.totalorder %s2962_s29, %s2958_s28 }
  0x55   : > { %p89_p8 = scmp.ne.s32.totalorder %s2958_s28, %s2954_s27  ;;  %p3623_p9 = scmp.lt.s32.totalorder %s2994_s15, 4 }
  0x56   : > { %s351_s17 = sand.u32 1, %s2994_s15   ;;  %p85_p10 = por %p83_p6, %p3624_p3 }
  0x57   : > { %p3661_p11 = scmp.eq.s32.totalorder %s3112_s16, 0  ;;  %s353_s25 = sand.u32 1, %s2962_s29  }
  0x58   : > { %s3202_s26 = sshll.u32 %s353_s25, 5  ;;  %s3618_s22 = sshll.u32 %s2990_s14, 9 }
  0x59   : > { %p3197_p12 = por %p89_p8, %p3661_p11  ;;  %s3664_s1 = sld [smem:[#allocation33_spill]] }
  0x5a   : > { %s355_s27 = scalar_lea.vmem [#allocation7], %s3202_s26  ;;  %p3215_p13 = pnand %p3623_p9, %p85_p10 }
  0x5b   : > { %s3662_s12 = scalar_select %p3197_p12, 1, 0 }
  0x5c   : > { %s362_s0 = sshll.u32 %s355_s27, 4  ;;  %s3222_s11 = scalar_lea.sflag [#allocation8], %s351_s17  ;;  %s3220_s0 = int_to_ptr.vmem [resolvable:$true] %s362_s0 }
  0x5d   : > { %3663 = sst [smem:[#allocation28_spill]] %s3662_s12  ;;  %p3635_p2 = pneg %p3215_p13 }
  0x5e   : > { %s3665_s7 = scalar_select %p3215_p13, 1, 0 }
  0x5f   : > { %s3210_s19 = scalar_lea.hbm %s3664_s1, %s3618_s22  ;;  %s2719_s22 = scalar_lea.hbm %s3664_s1, 1024 }
  0x60   : > { %3666 = sst [smem:[#allocation29_spill]] %s3665_s7  ;;  %s2714_s21 = scalar_lea.hbm %s3210_s19, 512 }
  0x61   : > { %p2715_p0 = scmp.ne.s32.totalorder %s3210_s19, %s2714_s21  ;;  %p2720_p8 = scmp.lt.u32.totalorder %s3210_s19, %s3664_s1 }
  0x62   : > { %p2721_p10 = scmp.lt.u32.totalorder %s2719_s22, %s2714_s21  ;;  %p2723_p9 = scmp.lt.u32.totalorder %s2714_s21, %s3210_s19 }
  0x63   : > { %p2717_p4 = pnand %p3635_p2, %p2715_p0 }
  0x64   : > { %p2722_p11 = por %p2721_p10, %p2720_p8 }
  0x65   : > { %p2718_p6 = pneg %p2717_p4 }
  0x66   : > { %p2724_p1 = por %p2723_p9, %p2722_p11 }
  0x68   : > { %p2725_p3 = pnand %p2724_p1, %p2718_p6 }
  0x6a   : > { %2728 = shalt.err (!%p2725_p3)
}
  0x6b   : > { %s2729_s17 = scalar_lea.vmem %s3220_s0, 512  ;;  %s3000_s23 = smov [#allocation7]  }
  0x6c   : > { %p2730_p0 = scmp.ne.s32.totalorder %s3220_s0, %s2729_s17  ;;  %s2734_s27 = sshll.u32 %s3000_s23, 4  ;;  %s2735_s27 = int_to_ptr.vmem [resolvable:$false] %s2734_s27 }
  0x6d   : > { %s2736_s8 = scalar_lea.vmem %s2735_s27, 1024  ;;  %p2737_p5 = scmp.lt.s32.totalorder %s3220_s0, %s2735_s27 }
  0x6e   : > { %p2732_p4 = pnand %p2730_p0, %p3635_p2  ;;  %p2738_p8 = scmp.lt.s32.totalorder %s2736_s8, %s2729_s17 }
  0x70   : > { %p2733_p12 = pneg %p2732_p4  ;;  %p2739_p10 = por %p2738_p8, %p2737_p5 }
  0x72   : > { %p2740_p9 = pnand %p2739_p10, %p2733_p12 }
  0x74   : > { %2743 = shalt.err (!%p2740_p9)
}
  0x75   : > { %s3667_s24 = smov 8   ;;  %s3668_s22 = smov 128  }
  0x76   : > { %2318 = dma.hbm_to_vmem [thread:$0]  (!%p3215_p13), %s3210_s19, 512, %s3220_s0, %s3222_s11, %s3668_s22, %s3668_s22, %s3667_s24  }
  0x77   : > { %s3669_s21 = sshll.u32 %s2990_s14, 9  ;;  %s376_s27 = scalar_lea.vmem [#allocation9], %s3202_s26 }
  0x78   : > { %s3258_s17 = scalar_lea.hbm %s3604_s2, %s3669_s21  ;;  %s3261_s8 = sshll.u32 %s376_s27, 4  ;;  %s3367_s8 = int_to_ptr.vmem [resolvable:$true] %s3261_s8 }
  0x79   : > { %s3001_s1 = smov [#allocation12]   ;;  %s3670_s4 = sld [smem:[#allocation35_spill]] }
  0x7a   : > { %s284_s3 = sshll.u32 %s3001_s1, 4  ;;  %s285_s3 = int_to_ptr.vmem [resolvable:$true] %s284_s3 }
  0x7f   : > { %s2744_s28 = scalar_lea.hbm %s3670_s4, 4096 }
  0x80   : > { %p2745_p5 = scmp.ne.s32.totalorder %s3670_s4, %s2744_s28  ;;  %p2751_p12 = scmp.lt.u32.totalorder %s2744_s28, %s3670_s4 }
  0x82   : > { %p2747_p1 = pnand %p2745_p5, %p3139_p7 }
  0x84   : > { %p2748_p3 = pneg %p2747_p1 }
  0x86   : > { %p2753_p6 = pnand %p2751_p12, %p2748_p3 }
  0x88   : > { %2756 = shalt.err (!%p2753_p6)
}
  0x89   : > { %s2757_s26 = scalar_lea.vmem %s285_s3, 4096  ;;  %p2765_p8 = scmp.lt.s32.totalorder %s285_s3, %s285_s3 }
  0x8a   : > { %p2758_p11 = scmp.ne.s32.totalorder %s285_s3, %s2757_s26  ;;  %p2766_p10 = scmp.lt.s32.totalorder %s2757_s26, %s2757_s26 }
  0x8c   : > { %p2760_p0 = pnand %p2758_p11, %p3139_p7  ;;  %p2767_p9 = por %p2766_p10, %p2765_p8 }
  0x8e   : > { %p2761_p4 = pneg %p2760_p0 }
  0x90   : > { %p2768_p2 = pnand %p2767_p9, %p2761_p4 }
  0x92   : > { %2771 = shalt.err (!%p2768_p2)
}
  0x93   : > { %p3671_p5 = scmp.ne.s32.totalorder %s3657_s20, 0  ;;  %s3002_s28 = smov [#allocation15]  }
  0x94   : > { %s310_s29 = sshll.u32 %s3002_s28, 4  ;;  %s3672_s6 = sld [smem:[#allocation37_spill]]  ;;  %s311_s29 = int_to_ptr.vmem [resolvable:$true] %s310_s29 }
  0x95   : > { %2305 = dma.hbm_to_vmem [thread:$0]  (!%p3671_p5), %s3670_s4, 4096, %s285_s3, [#allocation11], %s3668_s22, %s3668_s22, %s3667_s24  }
  0x9a   : > { %s2772_s25 = scalar_lea.hbm %s3672_s6, 4096 }
  0x9b   : > { %p2773_p2 = scmp.ne.s32.totalorder %s3672_s6, %s2772_s25  ;;  %p2779_p12 = scmp.lt.u32.totalorder %s2772_s25, %s3672_s6 }
  0x9d   : > { %p2775_p1 = pnand %p2773_p2, %p3139_p7 }
  0x9f   : > { %p2776_p3 = pneg %p2775_p1 }
  0xa1   : > { %p2781_p6 = pnand %p2779_p12, %p2776_p3 }
  0xa3   : > { %2784 = shalt.err (!%p2781_p6)
}
  0xa4   : > { %s2785_s3 = scalar_lea.vmem %s311_s29, 4096  ;;  %p2793_p8 = scmp.lt.s32.totalorder %s311_s29, %s311_s29 }
  0xa5   : > { %p2786_p11 = scmp.ne.s32.totalorder %s311_s29, %s2785_s3  ;;  %p2794_p10 = scmp.lt.s32.totalorder %s2785_s3, %s2785_s3 }
  0xa7   : > { %p2788_p0 = pnand %p2786_p11, %p3139_p7  ;;  %p2795_p9 = por %p2794_p10, %p2793_p8 }
  0xa9   : > { %p2789_p4 = pneg %p2788_p0 }
  0xab   : > { %p2796_p13 = pnand %p2795_p9, %p2789_p4 }
  0xad   : > { %2799 = shalt.err (!%p2796_p13)
}
  0xae   : > { %2311 = dma.hbm_to_vmem [thread:$0]  (!%p3671_p5), %s3672_s6, 4096, %s311_s29, [#allocation14], %s3668_s22, %s3668_s22, %s3667_s24  }
  0xaf   : > { %s2045_s20 = sadd.s32 4294967294, %s2994_s15   ;;  %s38_s18 = sadd.s32 1, %s2986_s13 }
  0xb0   : > { %p39_p7 = scmp.ge.s32.totalorder %s38_s18, 2  ;;  %s50_s1 = sadd.s32 1, %s2974_s10 }
  0xb1   : > { %p57_p13 = scmp.ne.s32.totalorder %s2974_s10, %s2970_s9  ;;  %p63_p2 = scmp.ne.s32.totalorder %s2970_s9, %s2966_s30 }
  0xb2   : > { %s3725_s18 = smov (%p39_p7, %s38_s18), 0  ;;  %s3674_s5 = sadd.s32 1, %s2990_s14 }
  0xb3   : > { %3673 = sst [smem:[#allocation30_spill]] %s3725_s18  ;;  %s3675_s28 = sld [smem:[#allocation23_spill]] }
  0xb4   : > { %s3727_s5 = smov (!%p39_p7, %s3674_s5), %s2990_s14  ;;  %s46_s12 = ssub.s32 %s2986_s13, %s3725_s18 }
  0xb5   : > { %p3676_p1 = scmp.eq.s32.totalorder %s2994_s15, 0  ;;  %p43_p3 = scmp.ge.s32.totalorder %s3727_s5, 2 }
  0xb6   : > { %p3678_p12 = scmp.eq.s32.totalorder %s3112_s16, 0  ;;  %p3680_p11 = scmp.eq.s32.totalorder %s3112_s16, 3 }
  0xb7   : > { %p3321_p5 = por %p3676_p1, %p57_p13  ;;  %p252_p4 = scmp.eq.s32.totalorder %s2045_s20, 3 }
  0xb8   : > { %p3327_p6 = por %p3678_p12, %p63_p2  ;;  %p3333_p0 = por %p3680_p11, %p57_p13 }
  0xb9   : > { %s3729_s5 = smov (%p43_p3, %s3727_s5), 0  ;;  %p3339_p8 = por %p252_p4, %p63_p2 }
  0xba   : > { %s3681_s25 = scalar_select %p3333_p0, 1, 0 }
  0xbb   : > { %s3682_s21 = scalar_select %p3339_p8, 1, 0 }
  0xbc   : > { %s327_s23 = sand.u32 1, %s2974_s10   ;;  %s45_s27 = ssub.s32 %s2990_s14, %s3729_s5 }
  0xbd   : > { %3683 = sst [smem:[#allocation31_spill]] %s3682_s21  ;;  %s47_s19 = sor.u32 %s46_s12, %s45_s27 }
  0xbe   : > { %p74_p10 = scmp.eq.s32.totalorder %s45_s27, 0  ;;  %p48_p9 = scmp.eq.s32.totalorder %s47_s19, 0 }
  0xbf   : > { %s2052_s3 = sshll.u32 %s327_s23, 4  ;;  %s3684_s0 = sadd.s32 1, %s3675_s28 }
  0xc0   : > { %s3731_s28 = smov (!%p74_p10, %s3675_s28), %s3684_s0  ;;  %s2223_s20 = sshll.u32 %s2986_s13, 2 }
  0xc1   : > { %s3352_s26 = scalar_select %p48_p9, %s2974_s10, %s50_s1  }
  0xc2   : > { %s2055_s4 = sshll.u32 %s2990_s14, 3  ;;  %s331_s6 = scalar_lea.vmem [#allocation4], %s2052_s3 }
  0xc3   : > { %s341_s18 = sshll.u32 %s331_s6, 4  ;;  %s338_s30 = sadd.s32 %s2223_s20, %s2055_s4  ;;  %s3356_s18 = int_to_ptr.vmem [resolvable:$true] %s341_s18 }
  0xc4   : > { %s2056_s21 = sshll.u32 %s338_s30, 6  ;;  %p3685_p7 = scmp.lt.s32.totalorder %s2994_s15, 4 }
  0xc5   : > { %s3687_s19 = sld [smem:[#allocation32_spill]]  ;;  %s3374_s4 = scalar_lea.sflag [#allocation5], %s327_s23 }
  0xc6   : > { %p3362_p13 = pnand %p3685_p7, %p3321_p5 }
  0xc8   : > { %p2802_p1 = pneg %p3362_p13 }
  0xcb   : > { %s3372_s0 = scalar_lea.hbm %s3687_s19, %s2056_s21  ;;  %s2805_s3 = scalar_lea.hbm %s3687_s19, 1024 }
  0xcc   : > { %s2800_s6 = scalar_lea.hbm %s3372_s0, 256  ;;  %p2806_p12 = scmp.lt.u32.totalorder %s3372_s0, %s3687_s19 }
  0xcd   : > { %p2801_p2 = scmp.ne.s32.totalorder %s3372_s0, %s2800_s6  ;;  %p2807_p11 = scmp.lt.u32.totalorder %s2805_s3, %s2800_s6 }
  0xce   : > { %p2809_p10 = scmp.lt.u32.totalorder %s2800_s6, %s3372_s0 }
  0xcf   : > { %p2803_p5 = pnand %p2802_p1, %p2801_p2  ;;  %p2808_p4 = por %p2807_p11, %p2806_p12 }
  0xd1   : > { %p2804_p3 = pneg %p2803_p5  ;;  %p2810_p9 = por %p2809_p10, %p2808_p4 }
  0xd3   : > { %p2811_p7 = pnand %p2810_p9, %p2804_p3 }
  0xd5   : > { %2814 = shalt.err (!%p2811_p7)
}
  0xd6   : > { %s2815_s23 = scalar_lea.vmem %s3356_s18, 256  ;;  %s3003_s1 = smov [#allocation4]  }
  0xd7   : > { %p2816_p2 = scmp.ne.s32.totalorder %s3356_s18, %s2815_s23  ;;  %s2820_s27 = sshll.u32 %s3003_s1, 4  ;;  %s2821_s27 = int_to_ptr.vmem [resolvable:$false] %s2820_s27 }
  0xd8   : > { %s2822_s30 = scalar_lea.vmem %s2821_s27, 512  ;;  %p2823_p0 = scmp.lt.s32.totalorder %s3356_s18, %s2821_s27 }
  0xd9   : > { %p2818_p5 = pnand %p2816_p2, %p2802_p1  ;;  %p2824_p12 = scmp.lt.s32.totalorder %s2822_s30, %s2815_s23 }
  0xdb   : > { %p2819_p8 = pneg %p2818_p5  ;;  %p2825_p11 = por %p2824_p12, %p2823_p0 }
  0xdd   : > { %p2826_p4 = pnand %p2825_p11, %p2819_p8 }
  0xdf   : > { %2829 = shalt.err (!%p2826_p4)
}
  0xe0   : > { %s3688_s6 = sld [smem:[#allocation29_spill]]  ;;  %s2830_s29 = scalar_lea.hbm %s3258_s17, 512 }
  0xe1   : > { %2315 = dma.hbm_to_vmem [thread:$0]  (!%p3362_p13), %s3372_s0, 256, %s3356_s18, %s3374_s4, %s3668_s22, %s3668_s22, %s3667_s24  }
  0xe2   : > { %p2831_p1 = scmp.ne.s32.totalorder %s3258_s17, %s2830_s29  ;;  %s2835_s21 = scalar_lea.hbm %s3604_s2, 1024 }
  0xe3   : > { %p2836_p9 = scmp.lt.u32.totalorder %s3258_s17, %s3604_s2  ;;  %p2837_p7 = scmp.lt.u32.totalorder %s2835_s21, %s2830_s29 }
  0xe4   : > { %p2839_p5 = scmp.lt.u32.totalorder %s2830_s29, %s3258_s17 }
  0xe5   : > { %p2838_p2 = por %p2837_p7, %p2836_p9 }
  0xe6   : > { %p3689_p3 = scmp.ne.s32.totalorder %s3688_s6, 0 }
  0xe7   : > { %p2840_p12 = por %p2839_p5, %p2838_p2 }
  0xe8   : > { %p3690_p0 = pneg %p3689_p3 }
  0xea   : > { %p2833_p8 = pnand %p2831_p1, %p3690_p0 }
  0xec   : > { %p2834_p10 = pneg %p2833_p8 }
  0xee   : > { %p2841_p11 = pnand %p2840_p12, %p2834_p10 }
  0xf0   : > { %2844 = shalt.err (!%p2841_p11)
}
  0xf1   : > { %s2845_s18 = scalar_lea.vmem %s3367_s8, 512  ;;  %p3691_p4 = pmov %p3690_p0 }
  0xf2   : > { %p2846_p13 = scmp.ne.s32.totalorder %s3367_s8, %s2845_s18  ;;  %s3004_s0 = smov [#allocation9]  }
  0xf3   : > { %s2850_s4 = sshll.u32 %s3004_s0, 4  ;;  %s2851_s4 = int_to_ptr.vmem [resolvable:$false] %s2850_s4 }
  0xf4   : > { %p2848_p1 = pnand %p2846_p13, %p3691_p4  ;;  %s2852_s1 = scalar_lea.vmem %s2851_s4, 1024 }
  0xf5   : > { %p2853_p8 = scmp.lt.s32.totalorder %s3367_s8, %s2851_s4  ;;  %p2854_p9 = scmp.lt.s32.totalorder %s2852_s1, %s2845_s18 }
  0xf6   : > { %p2849_p0 = pneg %p2848_p1 }
  0xf7   : > { %p2855_p7 = por %p2854_p9, %p2853_p8 }
  0xf9   : > { %p2856_p2 = pnand %p2855_p7, %p2849_p0 }
  0xfb   : > { %2859 = shalt.err (!%p2856_p2)
}
  0xfc   : > { %2321 = dma.hbm_to_vmem [thread:$0]  (!%p3689_p3), %s3258_s17, 512, %s3367_s8, %s3222_s11, %s3668_s22, %s3668_s22, %s3667_s24  }
  0xfd   : > { %s3692_s27 = sld [smem:[#allocation27_spill]] }
 0x103   : > { %p3693_p10 = scmp.ne.s32.totalorder %s3692_s27, 0 }
 0x104   : > { %s3435_s30 = sand.u32 (!%p3693_p10), 1, %s2970_s9  }
 0x105   : > { %395 = sbr.rel (%p3693_p10) target bundleno = 1730 (0x6c2), region = 52  ;;  %s2064_s29 = sshll.u32 (!%p3693_p10), %s3435_s30, 4 }
 0x106   : > { %s398_s3 = scalar_lea.sflag (!%p3693_p10), [#allocation5], %s3435_s30  ;;  %s3439_s12 = scalar_lea.vmem (!%p3693_p10), [#allocation4], %s2064_s29 }
 0x10c   : > { %2933 = dma.done.wait (%p3327_p6), %s398_s3, 256  }
 0x10d   : > { %2935 = vsyncadd (%p3327_p6), %s398_s3, 4294967040  ;;  %s3694_s11 = sld [smem:[#allocation22_spill]]  ;;  %s3695_s24 = sld [smem:[#allocation28_spill]] }
 0x10e   : > { %s406_s22 = sand.u32 1, %s3112_s16  }
 0x10f   : > { %s407_s6 = scalar_lea.sflag [#allocation8], %s406_s22 }
 0x113   : > { %s408_s17 = sand.u32 1, %s3694_s11   ;;  %p3696_p3 = scmp.ne.s32.totalorder %s3695_s24, 0 }
 0x114   : > { %s2065_s8 = sshll.u32 %s408_s17, 5 }
 0x115   : > { %s3447_s21 = scalar_lea.vmem [#allocation7], %s2065_s8 }
 0x116   : > { %2937 = dma.done.wait (%p3696_p3), %s407_s6, 1024  }
 0x117   : > { %2939 = vsyncadd (%p3696_p3), %s407_s6, 4294966272  ;;  %s3453_s20 = scalar_lea.vmem [#allocation9], %s2065_s8  ;;  %p3697_p5 = scmp.eq.s32.totalorder %s3112_s16, 0 }
 0x119   : > { %2941 = dma.done.wait (%p3697_p5), [#allocation11], 8192   ;;  %p3698_p6 = pmov %p3697_p5 }
 0x11a   : > { %p3699_p12 = pmov %p3697_p5 }
 0x11b   : > { %2943 = vsyncadd (%p3698_p6), [#allocation11], 4294959104 }
 0x11c   : > { %2945 = dma.done.wait (%p3699_p12), [#allocation14], 8192   ;;  %p3700_p11 = pmov %p3697_p5 }
 0x11d   : > { %s2071_s7 = sshll.u32 %s3435_s30, 5  ;;  %s3701_s18 = sld [smem:[#allocation25_spill]] }
 0x11e   : > { %2947 = vsyncadd (%p3700_p11), [#allocation14], 4294959104  ;;  %s3464_s23 = scalar_lea.vmem [#allocation16], %s2071_s7 }
 0x123   : > { %p2072_p13 = scmp.ne.s32.totalorder %s3701_s18, 0 }
 0x124   : > { %v2435_v0 = vld [vmem:[#allocation12 + $0x4] ss:$8 sps:$4 sm:$0xff] (!%p2072_p13)   ;;  %v2439_v2 = vld [vmem:[#allocation12] ss:$8 sps:$4 sm:$0xff] (!%p2072_p13)   ;;  %v2441_v4 = vld [vmem:[#allocation12 + $0x14] ss:$8 sps:$4 sm:$0xff] (!%p2072_p13)  }
 0x125   : > { %484 = sbr.rel (%p2072_p13) target bundleno = 586 (0x24a), region = 84  ;;  %v2437_v1 = vld [vmem:[#allocation13 + $0x4] ss:$8 sps:$4 sm:$0xff] (!%p2072_p13)   ;;  %714 = vmatprep.subr.bf16.mxu0 (!%p2072_p13), %v2435_v0  ;;  %v2440_v3 = vld [vmem:[#allocation13] ss:$8 sps:$4 sm:$0xff] (!%p2072_p13)   ;;  %s3702_s4 = sld [smem:[#allocation38_spill]] (!%p2072_p13) }
 0x126   : > { %996 = vmatprep.subr.bf16.mxu1 (!%p2072_p13), %v2437_v1  ;;  %715 = vmatpush1.bf16.msra.mxu0 (!%p2072_p13), %v2439_v2  ;;  %v2443_v5 = vld [vmem:[#allocation13 + $0x14] ss:$8 sps:$4 sm:$0xff] (!%p2072_p13)   ;;  %v2445_v6 = vld [vmem:[#allocation12 + $0x10] ss:$8 sps:$4 sm:$0xff] (!%p2072_p13)   ;;  %v2447_v8 = vld [vmem:[#allocation12 + $0x24] ss:$8 sps:$4 sm:$0xff] (!%p2072_p13)  }
 0x127   : > { %997 = vmatpush1.bf16.msra.mxu1 (!%p2072_p13), %v2440_v3  ;;  %716 = vmatprep.subr.bf16.mxu0 (!%p2072_p13), %v2441_v4  ;;  %v2446_v7 = vld [vmem:[#allocation13 + $0x10] ss:$8 sps:$4 sm:$0xff] (!%p2072_p13)   ;;  %v2449_v9 = vld [vmem:[#allocation13 + $0x24] ss:$8 sps:$4 sm:$0xff] (!%p2072_p13)   ;;  %v2451_v10 = vld [vmem:[#allocation12 + $0x20] ss:$8 sps:$4 sm:$0xff] (!%p2072_p13)  }
 0x128   : > { %998 = vmatprep.subr.bf16.mxu1 (!%p2072_p13), %v2443_v5  ;;  %v2452_v11 = vld [vmem:[#allocation13 + $0x20] ss:$8 sps:$4 sm:$0xff] (!%p2072_p13)   ;;  %v2453_v12 = vld [vmem:[#allocation12 + $0x34] ss:$8 sps:$4 sm:$0xff] (!%p2072_p13)   ;;  %v2457_v14 = vld [vmem:[#allocation12 + $0x30] ss:$8 sps:$4 sm:$0xff] (!%p2072_p13)  }
 0x129   : > { %v2455_v13 = vld [vmem:[#allocation13 + $0x34] ss:$8 sps:$4 sm:$0xff] (!%p2072_p13)   ;;  %v2458_v15 = vld [vmem:[#allocation13 + $0x30] ss:$8 sps:$4 sm:$0xff] (!%p2072_p13)   ;;  %v2459_v16 = vld [vmem:[#allocation12 + $0x44] ss:$8 sps:$4 sm:$0xff] (!%p2072_p13)  }
 0x12a   : > { %717 = vmatpush1.bf16.msra.mxu0 (!%p2072_p13), %v2445_v6  ;;  %v2461_v17 = vld [vmem:[#allocation13 + $0x44] ss:$8 sps:$4 sm:$0xff] (!%p2072_p13)   ;;  %v2463_v18 = vld [vmem:[#allocation12 + $0x40] ss:$8 sps:$4 sm:$0xff] (!%p2072_p13)   ;;  %v2465_v20 = vld [vmem:[#allocation12 + $0x54] ss:$8 sps:$4 sm:$0xff] (!%p2072_p13)  }
 0x12b   : > { %999 = vmatpush1.bf16.msra.mxu1 (!%p2072_p13), %v2446_v7  ;;  %718 = vmatprep.subr.bf16.mxu0 (!%p2072_p13), %v2447_v8  ;;  %v2464_v19 = vld [vmem:[#allocation13 + $0x40] ss:$8 sps:$4 sm:$0xff] (!%p2072_p13)   ;;  %v2467_v21 = vld [vmem:[#allocation13 + $0x54] ss:$8 sps:$4 sm:$0xff] (!%p2072_p13)   ;;  %v2469_v22 = vld [vmem:[#allocation12 + $0x50] ss:$8 sps:$4 sm:$0xff] (!%p2072_p13)   ;;  %v524_v8 = vlaneseq (!%p2072_p13) }
 0x12c   : > { %1000 = vmatprep.subr.bf16.mxu1 %v2449_v9  ;;  %v2470_v23 = vld [vmem:[#allocation13 + $0x50] ss:$8 sps:$4 sm:$0xff]   ;;  %v2471_v24 = vld [vmem:[#allocation12 + $0x64] ss:$8 sps:$4 sm:$0xff]   ;;  %v2475_v26 = vld [vmem:[#allocation12 + $0x60] ss:$8 sps:$4 sm:$0xff]  }
 0x12d   : > { %v2473_v25 = vld [vmem:[#allocation13 + $0x64] ss:$8 sps:$4 sm:$0xff]   ;;  %v2476_v27 = vld [vmem:[#allocation13 + $0x60] ss:$8 sps:$4 sm:$0xff]   ;;  %v2477_v28 = vld [vmem:[#allocation12 + $0x74] ss:$8 sps:$4 sm:$0xff]  }
 0x12e   : > { %719 = vmatpush1.bf16.msra.mxu0 %v2451_v10  ;;  %v2479_v29 = vld [vmem:[#allocation13 + $0x74] ss:$8 sps:$4 sm:$0xff]   ;;  %v2481_v30 = vld [vmem:[#allocation12 + $0x70] ss:$8 sps:$4 sm:$0xff]   ;;  %v2483_v32 = vld [vmem:[#allocation12 + $0x84] ss:$8 sps:$4 sm:$0xff]  }
 0x12f   : > { %1001 = vmatpush1.bf16.msra.mxu1 %v2452_v11  ;;  %720 = vmatprep.subr.bf16.mxu0 %v2453_v12  ;;  %v2482_v31 = vld [vmem:[#allocation13 + $0x70] ss:$8 sps:$4 sm:$0xff]   ;;  %v2485_v33 = vld [vmem:[#allocation13 + $0x84] ss:$8 sps:$4 sm:$0xff]   ;;  %v2487_v34 = vld [vmem:[#allocation12 + $0x80] ss:$8 sps:$4 sm:$0xff]  }
 0x130   : > { %1002 = vmatprep.subr.bf16.mxu1 %v2455_v13  ;;  %v2488_v35 = vld [vmem:[#allocation13 + $0x80] ss:$8 sps:$4 sm:$0xff]   ;;  %v2489_v36 = vld [vmem:[#allocation12 + $0x94] ss:$8 sps:$4 sm:$0xff]   ;;  %v2493_v38 = vld [vmem:[#allocation12 + $0x90] ss:$8 sps:$4 sm:$0xff]  }
 0x131   : > { %v2491_v37 = vld [vmem:[#allocation13 + $0x94] ss:$8 sps:$4 sm:$0xff]   ;;  %v2494_v39 = vld [vmem:[#allocation13 + $0x90] ss:$8 sps:$4 sm:$0xff]   ;;  %v2495_v40 = vld [vmem:[#allocation12 + $0xa4] ss:$8 sps:$4 sm:$0xff]  }
 0x132   : > { %721 = vmatpush1.bf16.msra.mxu0 %v2457_v14  ;;  %v2497_v41 = vld [vmem:[#allocation13 + $0xa4] ss:$8 sps:$4 sm:$0xff]   ;;  %v2499_v42 = vld [vmem:[#allocation12 + $0xa0] ss:$8 sps:$4 sm:$0xff]   ;;  %v2501_v44 = vld [vmem:[#allocation12 + $0xb4] ss:$8 sps:$4 sm:$0xff]  }
 0x133   : > { %1003 = vmatpush1.bf16.msra.mxu1 %v2458_v15  ;;  %722 = vmatprep.subr.bf16.mxu0 %v2459_v16  ;;  %v2500_v43 = vld [vmem:[#allocation13 + $0xa0] ss:$8 sps:$4 sm:$0xff]   ;;  %v2503_v45 = vld [vmem:[#allocation13 + $0xb4] ss:$8 sps:$4 sm:$0xff]   ;;  %v2505_v46 = vld [vmem:[#allocation12 + $0xb0] ss:$8 sps:$4 sm:$0xff]  }
 0x134   : > { %1004 = vmatprep.subr.bf16.mxu1 %v2461_v17  ;;  %v2506_v47 = vld [vmem:[#allocation13 + $0xb0] ss:$8 sps:$4 sm:$0xff]   ;;  %v2507_v48 = vld [vmem:[#allocation12 + $0xc4] ss:$8 sps:$4 sm:$0xff]   ;;  %v2511_v52 = vld [vmem:[#allocation12 + $0xc0] ss:$8 sps:$4 sm:$0xff]  }
 0x135   : > { %v2533_v49 = vld [vmem:[%s3447_s21 + $0x4] ss:$8 sps:$4 sm:$0xff]   ;;  %v2512_v53 = vld [vmem:[#allocation13 + $0xc0] ss:$8 sps:$4 sm:$0xff]   ;;  %v2513_v54 = vld [vmem:[#allocation12 + $0xd4] ss:$8 sps:$4 sm:$0xff]  }
 0x136   : > { %723 = vmatpush1.bf16.msra.mxu0 %v2463_v18  ;;  %v2509_v50 = vld [vmem:[#allocation13 + $0xc4] ss:$8 sps:$4 sm:$0xff]   ;;  %746 = vmatprep.mubr.bf16.mxu0 %v2533_v49  ;;  %v2515_v55 = vld [vmem:[#allocation13 + $0xd4] ss:$8 sps:$4 sm:$0xff]   ;;  %v2517_v56 = vld [vmem:[#allocation12 + $0xd0] ss:$8 sps:$4 sm:$0xff]  }
 0x137   : > { %1005 = vmatpush1.bf16.msra.mxu1 %v2464_v19  ;;  %724 = vmatprep.subr.bf16.mxu0 %v2465_v20  ;;  %v2536_v51 = vld [vmem:[%s3453_s20 + $0x4] ss:$8 sps:$4 sm:$0xff]   ;;  %v2518_v57 = vld [vmem:[#allocation13 + $0xd0] ss:$8 sps:$4 sm:$0xff]   ;;  %v2523_v60 = vld [vmem:[#allocation12 + $0xe0] ss:$8 sps:$4 sm:$0xff]  }
 0x138   : > { %1006 = vmatprep.subr.bf16.mxu1 %v2467_v21  ;;  %1028 = vmatprep.mubr.bf16.mxu1 %v2536_v51  ;;  %v2519_v58 = vld [vmem:[#allocation12 + $0xe4] ss:$8 sps:$4 sm:$0xff]   ;;  %v2524_v61 = vld [vmem:[#allocation13 + $0xe0] ss:$8 sps:$4 sm:$0xff]   ;;  %v2525_v62 = vld [vmem:[#allocation12 + $0xf4] ss:$8 sps:$4 sm:$0xff]  }
 0x139   : > { %v2521_v59 = vld [vmem:[#allocation13 + $0xe4] ss:$8 sps:$4 sm:$0xff]   ;;  %v2527_v63 = vld [vmem:[#allocation13 + $0xf4] ss:$8 sps:$4 sm:$0xff]   ;;  %v2529_v0 = vld [vmem:[#allocation12 + $0xf0] ss:$8 sps:$4 sm:$0xff]  }
 0x13a   : > { %725 = vmatpush1.bf16.msra.mxu0 %v2469_v22  ;;  %v2530_v1 = vld [vmem:[#allocation13 + $0xf0] ss:$8 sps:$4 sm:$0xff]   ;;  %v2531_v2 = vld [vmem:[%s3447_s21] ss:$8 sps:$4 sm:$0xff]   ;;  %v2537_v4 = vld [vmem:[%s3447_s21 + $0x14] ss:$8 sps:$4 sm:$0xff]  }
 0x13b   : > { %1007 = vmatpush1.bf16.msra.mxu1 %v2470_v23  ;;  %726 = vmatprep.subr.bf16.mxu0 %v2471_v24  ;;  %v2534_v3 = vld [vmem:[%s3453_s20] ss:$8 sps:$4 sm:$0xff]   ;;  %v2539_v5 = vld [vmem:[%s3453_s20 + $0x14] ss:$8 sps:$4 sm:$0xff]   ;;  %v2541_v6 = vld [vmem:[%s3447_s21 + $0x10] ss:$8 sps:$4 sm:$0xff]  }
 0x13c   : > { %1008 = vmatprep.subr.bf16.mxu1 %v2473_v25  ;;  %v2542_v7 = vld [vmem:[%s3453_s20 + $0x10] ss:$8 sps:$4 sm:$0xff]   ;;  %v525_v9 = vshrl.u32 %v524_v8, 7  ;;  %v2073_v10 = vld [vmem:[%s3702_s4 + $0x1] ss:$4 sm:$0x3] }
 0x13d   : > { %v2110_v12 = vld [vmem:[%s3702_s4 + $0x2] ss:$4 sm:$0x3] }
 0x13e   : > { %727 = vmatpush1.bf16.msra.mxu0 %v2475_v26  ;;  %v526_v11 = vsub.s32 0, %v525_v9  ;;  %v530_v13 = vsub.s32 1, %v525_v9 }
 0x13f   : > { %1009 = vmatpush1.bf16.msra.mxu1 %v2476_v27  ;;  %728 = vmatprep.subr.bf16.mxu0 %v2477_v28 }
 0x140   : > { %1010 = vmatprep.subr.bf16.mxu1 %v2479_v29  ;;  %v527_v14 = vrot.slane %v2073_v10, %v526_v11  ;;  %v809_v15 = vrot.slane %v2110_v12, %v526_v11  ;;  %v531_v18 = vrot.slane %v2073_v10, %v530_v13  ;;  %v813_v19 = vrot.slane %v2110_v12, %v530_v13 }
 0x142   : > { %729 = vmatpush1.bf16.msra.mxu0 %v2481_v30 }
 0x143   : > { %1011 = vmatpush1.bf16.msra.mxu1 %v2482_v31  ;;  %730 = vmatprep.subr.bf16.mxu0 %v2483_v32 }
 0x144   : > { %1012 = vmatprep.subr.bf16.mxu1 %v2485_v33 }
 0x146   : > { %731 = vmatpush1.bf16.msra.mxu0 %v2487_v34 }
 0x147   : > { %1013 = vmatpush1.bf16.msra.mxu1 %v2488_v35  ;;  %732 = vmatprep.subr.bf16.mxu0 %v2489_v36 }
 0x148   : > { %1014 = vmatprep.subr.bf16.mxu1 %v2491_v37 }
 0x14a   : > { %733 = vmatpush1.bf16.msra.mxu0 %v2493_v38 }
 0x14b   : > { %1015 = vmatpush1.bf16.msra.mxu1 %v2494_v39  ;;  %734 = vmatprep.subr.bf16.mxu0 %v2495_v40 }
 0x14c   : > { %1016 = vmatprep.subr.bf16.mxu1 %v2497_v41 }
 0x14e   : > { %735 = vmatpush1.bf16.msra.mxu0 %v2499_v42 }
 0x14f   : > { %1017 = vmatpush1.bf16.msra.mxu1 %v2500_v43  ;;  %736 = vmatprep.subr.bf16.mxu0 %v2501_v44 }
 0x150   : > { %1018 = vmatprep.subr.bf16.mxu1 %v2503_v45 }
 0x152   : > { %737 = vmatpush1.bf16.msra.mxu0 %v2505_v46 }
 0x153   : > { %1019 = vmatpush1.bf16.msra.mxu1 %v2506_v47  ;;  %738 = vmatprep.subr.bf16.mxu0 %v2507_v48 }
 0x154   : > { %1020 = vmatprep.subr.bf16.mxu1 %v2509_v50 }
 0x156   : > { %739 = vmatpush1.bf16.msra.mxu0 %v2511_v52 }
 0x157   : > { %1021 = vmatpush1.bf16.msra.mxu1 %v2512_v53  ;;  %740 = vmatprep.subr.bf16.mxu0 %v2513_v54 }
 0x158   : > { %1022 = vmatprep.subr.bf16.mxu1 %v2515_v55 }
 0x15a   : > { %741 = vmatpush1.bf16.msra.mxu0 %v2517_v56 }
 0x15b   : > { %1023 = vmatpush1.bf16.msra.mxu1 %v2518_v57  ;;  %742 = vmatprep.subr.bf16.mxu0 %v2519_v58 }
 0x15c   : > { %1024 = vmatprep.subr.bf16.mxu1 %v2521_v59 }
 0x15e   : > { %743 = vmatpush1.bf16.msra.mxu0 %v2523_v60 }
 0x15f   : > { %1025 = vmatpush1.bf16.msra.mxu1 %v2524_v61  ;;  %744 = vmatprep.subr.bf16.mxu0 %v2525_v62 }
 0x160   : > { %1026 = vmatprep.subr.bf16.mxu1 %v2527_v63 }
 0x162   : > { %745 = vmatpush1.bf16.msra.mxu0 %v2529_v0 }
 0x163   : > { %1027 = vmatpush1.bf16.msra.mxu1 %v2530_v1 }
 0x165   : > { %747 = vmatmul.mubr.bf16.vlgmr.msra.gmra.mrb[0].mxu0 %v2531_v2 }
 0x166   : > { %1029 = vmatmul.mubr.bf16.vlgmr.msra.gmra.mrb[0].mxu1 %v2534_v3  ;;  %756 = vmatprep.mubr.bf16.mxu0 %v2537_v4 }
 0x167   : > { %1038 = vmatprep.mubr.bf16.mxu1 %v2539_v5 }
 0x16d   : > { %757 = vmatmul.mubr.bf16.gmra.mrb[4].mxu0 %v2541_v6 }
 0x16e   : > { %1039 = vmatmul.mubr.bf16.gmra.mrb[4].mxu1 %v2542_v7 }
 0x238   : > { %v748_v16 = vpop.f32.mrb[0].mxu0 }
 0x239   : > { %v1030_v17 = vpop.f32.mrb[0].mxu1  ;;  %v750_v20 = vpop.f32.mrb[1].mxu0  ;;  %v749_v24 = vadd.f32 %v748_v16, %v527_v14 }
 0x23a   : > { %v1032_v21 = vpop.f32.mrb[1].mxu1  ;;  %v752_v22 = vpop.f32.mrb[2].mxu0  ;;  %v1031_v25 = vadd.f32 %v1030_v17, %v809_v15  ;;  %v751_v30 = vadd.f32 %v750_v20, %v531_v18 }
 0x23b   : > { %v1034_v23 = vpop.f32.mrb[2].mxu1  ;;  %v753_v26 = vadd.f32 %v752_v22, %v527_v14  ;;  %v754_v28 = vpop.f32.mrb[3].mxu0  ;;  %v1033_v31 = vadd.f32 %v1032_v21, %v813_v19 }
 0x23c   : > { %v1035_v27 = vadd.f32 %v1034_v23, %v809_v15  ;;  %v1036_v29 = vpop.f32.mrb[3].mxu1  ;;  %v755_v32 = vadd.f32 %v754_v28, %v531_v18 }
 0x23d   : > { %v1037_v33 = vadd.f32 %v1036_v29, %v813_v19  ;;  %v1049_v34 = vpack.c.bf16 %v753_v26, %v749_v24 }
 0x23e   : > { %v1057_v35 = vpack.c.bf16 %v1035_v27, %v1031_v25  ;;  %v1050_v36 = vpack.c.bf16 %v755_v32, %v751_v30 }
 0x23f   : > { %v1058_v37 = vpack.c.bf16 %v1037_v33, %v1033_v31  ;;  %1053 = vst [vmem:[#allocation2] sm:$0xff] %v1049_v34 }
 0x240   : > { %1061 = vst [vmem:[#allocation3] sm:$0xff] %v1057_v35  ;;  %1054 = vst [vmem:[#allocation2 + $0x8] sm:$0xff] %v1050_v36  ;;  %v758_v38 = vpop.f32.mrb[4].mxu0 }
 0x241   : > { %1062 = vst [vmem:[#allocation3 + $0x8] sm:$0xff] %v1058_v37  ;;  %v1040_v39 = vpop.f32.mrb[4].mxu1  ;;  %v760_v40 = vpop.f32.mrb[5].mxu0  ;;  %v759_v44 = vadd.f32 %v758_v38, %v527_v14 }
 0x242   : > { %v1042_v41 = vpop.f32.mrb[5].mxu1  ;;  %v762_v42 = vpop.f32.mrb[6].mxu0  ;;  %v1041_v45 = vadd.f32 %v1040_v39, %v809_v15  ;;  %v761_v50 = vadd.f32 %v760_v40, %v531_v18 }
 0x243   : > { %v1044_v43 = vpop.f32.mrb[6].mxu1  ;;  %v763_v46 = vadd.f32 %v762_v42, %v527_v14  ;;  %v764_v48 = vpop.f32.mrb[7].mxu0  ;;  %v1043_v51 = vadd.f32 %v1042_v41, %v813_v19 }
 0x244   : > { %v1045_v47 = vadd.f32 %v1044_v43, %v809_v15  ;;  %v1046_v49 = vpop.f32.mrb[7].mxu1  ;;  %v765_v52 = vadd.f32 %v764_v48, %v531_v18 }
 0x245   : > { %v1047_v53 = vadd.f32 %v1046_v49, %v813_v19  ;;  %v1051_v54 = vpack.c.bf16 %v763_v46, %v759_v44 }
 0x246   : > { %v1059_v55 = vpack.c.bf16 %v1045_v47, %v1041_v45  ;;  %v1052_v56 = vpack.c.bf16 %v765_v52, %v761_v50 }
 0x247   : > { %v1060_v57 = vpack.c.bf16 %v1047_v53, %v1043_v51  ;;  %1055 = vst [vmem:[#allocation2 + $0x10] sm:$0xff] %v1051_v54 }
 0x248   : > { %1063 = vst [vmem:[#allocation3 + $0x10] sm:$0xff] %v1059_v55  ;;  %1056 = vst [vmem:[#allocation2 + $0x18] sm:$0xff] %v1052_v56 }
 0x249   : > { %1064 = vst [vmem:[#allocation3 + $0x18] sm:$0xff] %v1060_v57 }
 0x24a PF: > { %v2543_v58 = vld [vmem:[#allocation10 + $0x4] ss:$8 sps:$4 sm:$0xff]   ;;  %v2545_v59 = vld [vmem:[#allocation10] ss:$8 sps:$4 sm:$0xff]   ;;  %v3005_v60 = vmov 0.0   ;;  %vm3006_vm0 = vmmov 0   ;;  %v1101_v33 = vlaneseq }
 0x24b   : > { %2255 = vmatprep.subr.bf16.mxu1 %v3005_v60  ;;  %1281 = vmatprep.subr.bf16.mxu0 %v2543_v58  ;;  %v2546_v61 = vld [vmem:[#allocation10 + $0x14] ss:$8 sps:$4 sm:$0xff]   ;;  %v2548_v62 = vld [vmem:[#allocation10 + $0x10] ss:$8 sps:$4 sm:$0xff]   ;;  %v2549_v63 = vld [vmem:[#allocation10 + $0x24] ss:$8 sps:$4 sm:$0xff]  }
 0x24c   : > { %1282 = vmatpush1.bf16.msra.mxu0 %v2545_v59  ;;  %v2551_v0 = vld [vmem:[#allocation10 + $0x20] ss:$8 sps:$4 sm:$0xff]   ;;  %v2552_v1 = vld [vmem:[#allocation10 + $0x34] ss:$8 sps:$4 sm:$0xff]   ;;  %v2554_v2 = vld [vmem:[#allocation10 + $0x30] ss:$8 sps:$4 sm:$0xff]   ;;  %2259 = vmatprep.mubr.msk.bf16.mxu1 %vm3006_vm0, %v3005_v60 }
 0x24d   : > { %1283 = vmatprep.subr.bf16.mxu0 %v2546_v61  ;;  %v2555_v3 = vld [vmem:[#allocation10 + $0x44] ss:$8 sps:$4 sm:$0xff]   ;;  %v2557_v4 = vld [vmem:[#allocation10 + $0x40] ss:$8 sps:$4 sm:$0xff]   ;;  %v2558_v5 = vld [vmem:[#allocation10 + $0x54] ss:$8 sps:$4 sm:$0xff]  }
 0x24e   : > { %v2560_v6 = vld [vmem:[#allocation10 + $0x50] ss:$8 sps:$4 sm:$0xff]   ;;  %v2561_v7 = vld [vmem:[#allocation10 + $0x64] ss:$8 sps:$4 sm:$0xff]   ;;  %v2563_v8 = vld [vmem:[#allocation10 + $0x60] ss:$8 sps:$4 sm:$0xff]  }
 0x24f   : > { %v2593_v9 = vld [vmem:[%s3439_s12 + $0x4] ss:$8 sps:$4 sm:$0xff]   ;;  %v2566_v12 = vld [vmem:[#allocation10 + $0x70] ss:$8 sps:$4 sm:$0xff]   ;;  %v2569_v14 = vld [vmem:[#allocation10 + $0x80] ss:$8 sps:$4 sm:$0xff]  }
 0x250   : > { %1284 = vmatpush1.bf16.msra.mxu0 %v2548_v62  ;;  %v2564_v10 = vld [vmem:[#allocation10 + $0x74] ss:$8 sps:$4 sm:$0xff]   ;;  %v1460_v11 = vld [vmem:[#allocation2 + $0x8] sm:$0xff]  ;;  %1313 = vmatprep.mubr.bf16.mxu0 %v2593_v9  ;;  %v2572_v16 = vld [vmem:[#allocation10 + $0x90] ss:$8 sps:$4 sm:$0xff]   ;;  %v3493_v34 = vshrl.u32 %v1101_v33, 7 }
 0x251   : > { %1285 = vmatprep.subr.bf16.mxu0 %v2549_v63  ;;  %2256 = vmatpush3.bf16.xpose.msra.mxu1 %v1460_v11  ;;  %v2567_v13 = vld [vmem:[#allocation10 + $0x84] ss:$8 sps:$4 sm:$0xff]   ;;  %v2570_v15 = vld [vmem:[#allocation10 + $0x94] ss:$8 sps:$4 sm:$0xff]   ;;  %v2575_v18 = vld [vmem:[#allocation10 + $0xa0] ss:$8 sps:$4 sm:$0xff]  }
 0x252   : > { %2257 = vmatprep.subr.bf16.mxu1 %v3005_v60  ;;  %v2573_v17 = vld [vmem:[#allocation10 + $0xa4] ss:$8 sps:$4 sm:$0xff]   ;;  %v2576_v19 = vld [vmem:[#allocation10 + $0xb4] ss:$8 sps:$4 sm:$0xff]   ;;  %v2578_v20 = vld [vmem:[#allocation10 + $0xb0] ss:$8 sps:$4 sm:$0xff]  }
 0x253   : > { %v2579_v21 = vld [vmem:[#allocation10 + $0xc4] ss:$8 sps:$4 sm:$0xff]   ;;  %v2581_v22 = vld [vmem:[#allocation10 + $0xc0] ss:$8 sps:$4 sm:$0xff]   ;;  %v2582_v23 = vld [vmem:[#allocation10 + $0xd4] ss:$8 sps:$4 sm:$0xff]  }
 0x254   : > { %1286 = vmatpush1.bf16.msra.mxu0 %v2551_v0  ;;  %v2584_v24 = vld [vmem:[#allocation10 + $0xd0] ss:$8 sps:$4 sm:$0xff]   ;;  %v2585_v25 = vld [vmem:[#allocation10 + $0xe4] ss:$8 sps:$4 sm:$0xff]   ;;  %v2587_v26 = vld [vmem:[#allocation10 + $0xe0] ss:$8 sps:$4 sm:$0xff]  }
 0x255   : > { %1287 = vmatprep.subr.bf16.mxu0 %v2552_v1  ;;  %v2588_v27 = vld [vmem:[#allocation10 + $0xf4] ss:$8 sps:$4 sm:$0xff]   ;;  %v2590_v28 = vld [vmem:[#allocation10 + $0xf0] ss:$8 sps:$4 sm:$0xff]   ;;  %v1330_v30 = vld [vmem:[#allocation2] sm:$0xff]  ;;  %v1103_v35 = vsub.s32 0, %v3493_v34 }
 0x256   : > { %v2591_v29 = vld [vmem:[%s3439_s12] ss:$8 sps:$4 sm:$0xff]   ;;  %s3703_s12 = sld [smem:[#allocation38_spill]]  ;;  %v1107_v37 = vsub.s32 1, %v3493_v34  ;;  %vm1375_vm1 = vcmask 261120   ;;  %s3704_s11 = sld [smem:[#allocation25_spill]] }
 0x257   : > { %v1331_v31 = vld [vmem:[#allocation2 + $0x10] sm:$0xff]  ;;  %v1461_v32 = vld [vmem:[#allocation2 + $0x18] sm:$0xff]  ;;  %v2600_v33 = vld [vmem:[#allocation15 + $0xa0] ss:$8 sps:$4 sm:$0xff]   ;;  %s3705_s24 = sld [smem:[#allocation26_spill]]  ;;  %s1873_s7 = sshll.u32 %s3464_s23, 4  ;;  %s3536_s7 = int_to_ptr.vmem [resolvable:$true] %s1873_s7 }
 0x258   : > { %1288 = vmatpush1.bf16.msra.mxu0 %v2554_v2  ;;  %s3706_s0 = sld [smem:[#allocation39_spill]]  ;;  %s1857_s1 = scalar_lea.sflag [#allocation6], %s3435_s30 }
 0x259   : > { %1289 = vmatprep.subr.bf16.mxu0 %v2555_v3  ;;  %2258 = vmatpush3.bf16.xpose.msra.mxu1 %v1461_v32  ;;  %v1332_v3 = vld [vmem:[#allocation3] sm:$0xff]  ;;  %s2860_s27 = scalar_lea.vmem %s3536_s7, 512  ;;  %p3707_p1 = scmp.ne.s32.totalorder %s3681_s25, 0 }
 0x25a   : > { %2263 = vmatprep.subr.bf16.mxu1 %v3005_v60  ;;  %v2602_v32 = vld [vmem:[#allocation15 + $0xa4] ss:$8 sps:$4 sm:$0xff]   ;;  %p2861_p4 = scmp.ne.s32.totalorder %s3536_s7, %s2860_s27  ;;  %s3008_s29 = smov [#allocation16]  }
 0x25b   : > { %s2864_s3 = sshll.u32 %s3008_s29, 4  ;;  %s2865_s3 = int_to_ptr.vmem [resolvable:$false] %s2864_s3 }
 0x25c   : > { %1290 = vmatpush1.bf16.msra.mxu0 %v2557_v4  ;;  %v1099_v36 = vld [vmem:[%s3703_s12] ss:$4 sm:$0x3]  ;;  %v1462_v4 = vld [vmem:[#allocation3 + $0x8] sm:$0xff]  ;;  %s2226_s8 = sshll.u32 %s3704_s11, 2  ;;  %p2862_p0 = pnand %p2861_p4, %p3707_p1 }
 0x25d   : > { %1291 = vmatprep.subr.bf16.mxu0 %v2558_v5  ;;  %v1104_v38 = vrot.slane %v1099_v36, %v1103_v35  ;;  %v1108_v39 = vrot.slane %v1099_v36, %v1107_v37  ;;  %v1333_v5 = vld [vmem:[#allocation3 + $0x10] sm:$0xff]  ;;  %s2219_s6 = sshll.u32 %s3705_s24, 3  ;;  %p2867_p9 = scmp.lt.s32.totalorder %s3536_s7, %s2865_s3 }
 0x25e   : > { %v2605_v36 = vld [vmem:[#allocation15 + $0xb4] ss:$8 sps:$4 sm:$0xff]   ;;  %s1870_s21 = sadd.s32 %s2226_s8, %s2219_s6  ;;  %p2863_p8 = pneg %p2862_p0 }
 0x25f   : > { %s2220_s20 = sshll.u32 %s1870_s21, 7 }
 0x260   : > { %1292 = vmatpush1.bf16.msra.mxu0 %v2560_v6  ;;  %v1463_v6 = vld [vmem:[#allocation3 + $0x18] sm:$0xff]  ;;  %s3534_s4 = scalar_lea.hbm %s3706_s0, %s2220_s20 }
 0x261   : > { %1293 = vmatprep.subr.bf16.mxu0 %v2561_v7 }
 0x264   : > { %1294 = vmatpush1.bf16.msra.mxu0 %v2563_v8 }
 0x265   : > { %1295 = vmatprep.subr.bf16.mxu0 %v2564_v10 }
 0x268   : > { %1296 = vmatpush1.bf16.msra.mxu0 %v2566_v12 }
 0x269   : > { %1297 = vmatprep.subr.bf16.mxu0 %v2567_v13 }
 0x26c   : > { %1298 = vmatpush1.bf16.msra.mxu0 %v2569_v14 }
 0x26d   : > { %1299 = vmatprep.subr.bf16.mxu0 %v2570_v15 }
 0x270   : > { %1300 = vmatpush1.bf16.msra.mxu0 %v2572_v16 }
 0x271   : > { %1301 = vmatprep.subr.bf16.mxu0 %v2573_v17 }
 0x274   : > { %1302 = vmatpush1.bf16.msra.mxu0 %v2575_v18 }
 0x275   : > { %1303 = vmatprep.subr.bf16.mxu0 %v2576_v19 }
 0x278   : > { %1304 = vmatpush1.bf16.msra.mxu0 %v2578_v20 }
 0x279   : > { %1305 = vmatprep.subr.bf16.mxu0 %v2579_v21 }
 0x27c   : > { %1306 = vmatpush1.bf16.msra.mxu0 %v2581_v22 }
 0x27d   : > { %1307 = vmatprep.subr.bf16.mxu0 %v2582_v23 }
 0x280   : > { %1308 = vmatpush1.bf16.msra.mxu0 %v2584_v24 }
 0x281   : > { %1309 = vmatprep.subr.bf16.mxu0 %v2585_v25 }
 0x284   : > { %1310 = vmatpush1.bf16.msra.mxu0 %v2587_v26 }
 0x285   : > { %1311 = vmatprep.subr.bf16.mxu0 %v2588_v27 }
 0x288   : > { %1312 = vmatpush1.bf16.msra.mxu0 %v2590_v28  ;;  %v2594_v28 = vld [vmem:[#allocation15 + $0x80] ss:$8 sps:$4 sm:$0xff]  }
 0x289   : > { %2239 = vmatprep.subr.bf16.mxu0 %v3005_v60 }
 0x28b   : > { %1314 = vmatmul.mubr.bf16.vlgmr.msra.gmra.mrb[0].mxu0 %v2591_v29  ;;  %v2596_v29 = vld [vmem:[#allocation15 + $0x84] ss:$8 sps:$4 sm:$0xff]  }
 0x28c   : > { %2243 = vmatprep.mubr.msk.bf16.mxu0 %vm3006_vm0, %v3005_v60 }
 0x291   : > { %2240 = vmatpush3.bf16.xpose.msra.mxu0 %v1330_v30  ;;  %v2599_v30 = vld [vmem:[#allocation15 + $0x94] ss:$8 sps:$4 sm:$0xff]  }
 0x292   : > { %2241 = vmatprep.subr.bf16.mxu0 %v3005_v60 }
 0x299   : > { %2242 = vmatpush3.bf16.xpose.msra.mxu0 %v1331_v31  ;;  %v2597_v31 = vld [vmem:[#allocation15 + $0x90] ss:$8 sps:$4 sm:$0xff]  }
 0x29a   : > { %2247 = vmatprep.subr.bf16.mxu0 %v3005_v60 }
 0x35e   : > { %v1315_v40 = vpop.f32.mrb[0].mxu0 }
 0x35f   : > { %v1316_v41 = vadd.f32 %v1315_v40, %v1104_v38  ;;  %v1317_v42 = vpop.f32.mrb[1].mxu0  ;;  %v2606_v40 = vld [vmem:[#allocation15 + $0xc0] ss:$8 sps:$4 sm:$0xff]  }
 0x360   : > { %v1318_v43 = vadd.f32 %v1317_v42, %v1108_v39  ;;  %v1319_v44 = vpop.f32.mrb[2].mxu0  ;;  %v2609_v42 = vld [vmem:[#allocation15 + $0xd0] ss:$8 sps:$4 sm:$0xff]  }
 0x361   : > { %v1320_v45 = vadd.f32 %v1319_v44, %v1104_v38  ;;  %v1321_v46 = vpop.f32.mrb[3].mxu0  ;;  %v1324_v48 = vmul.f32 0.088388346, %v1316_v41  ;;  %v2603_v38 = vld [vmem:[#allocation15 + $0xb0] ss:$8 sps:$4 sm:$0xff]  }
 0x362   : > { %v1322_v47 = vadd.f32 %v1321_v46, %v1108_v39  ;;  %v1325_v50 = vmul.f32 0.088388346, %v1318_v43  ;;  %v2608_v39 = vld [vmem:[#allocation15 + $0xc4] ss:$8 sps:$4 sm:$0xff]   ;;  %v2611_v41 = vld [vmem:[#allocation15 + $0xd4] ss:$8 sps:$4 sm:$0xff]  }
 0x363   : > { %v1326_v49 = vmul.f32 0.088388346, %v1320_v45  ;;  %v2614_v43 = vld [vmem:[#allocation15 + $0xe4] ss:$8 sps:$4 sm:$0xff]   ;;  %v2612_v44 = vld [vmem:[#allocation15 + $0xe0] ss:$8 sps:$4 sm:$0xff]  }
 0x364   : > { %v1327_v51 = vmul.f32 0.088388346, %v1322_v47  ;;  %v2617_v45 = vld [vmem:[#allocation15 + $0xf4] ss:$8 sps:$4 sm:$0xff]   ;;  %v2615_v46 = vld [vmem:[#allocation15 + $0xf0] ss:$8 sps:$4 sm:$0xff]  }
 0x365   : > { %v1328_v52 = vpack.c.bf16 %v1326_v49, %v1324_v48  ;;  %v2620_v47 = vld [vmem:[#allocation15 + $0x4] ss:$8 sps:$4 sm:$0xff]   ;;  %v3007_v48 = vmov 0  }
 0x366   : > { %v1329_v53 = vpack.c.bf16 %v1327_v51, %v1325_v50 }
 0x367   : > { %2244 = vmatmul.mubr.bf16.vlgmr.msra.gmra.mrb[4].mxu0 %v1328_v52 }
 0x368   : > { %2260 = vmatmul.mubr.bf16.vlgmr.msra.gmra.mrb[0].mxu1 %v1329_v53  ;;  %2251 = vmatprep.mubr.msk.bf16.mxu0 %vm3006_vm0, %v3005_v60 }
 0x369   : > { %2267 = vmatprep.mubr.msk.bf16.mxu1 %vm3006_vm0, %v3005_v60  ;;  %2248 = vmatpush3.bf16.msra.mxu0 %v1332_v3 }
 0x36a   : > { %2264 = vmatpush3.bf16.msra.mxu1 %v1462_v4  ;;  %2249 = vmatprep.subr.bf16.mxu0 %v3005_v60 }
 0x36b   : > { %2265 = vmatprep.subr.bf16.mxu1 %v3005_v60 }
 0x36d   : > { %2250 = vmatpush3.bf16.msra.mxu0 %v1333_v5 }
 0x36e   : > { %2266 = vmatpush3.bf16.msra.mxu1 %v1463_v6  ;;  %v2618_v6 = vld [vmem:[#allocation15] ss:$8 sps:$4 sm:$0xff]  }
 0x36f   : > { %1669 = vmatprep.subr.bf16.mxu1 %v2596_v29 }
 0x43a   : > { %v1368_v54 = vpop.f32.mrb[4].mxu0 }
 0x43b   : > { %v2245_v55 = vpop.f32.mrb[5].mxu0  ;;  %v1498_v56 = vpop.f32.mrb[0].mxu1  ;;  %v1376_v57 = vsel %vm1375_vm1, %v1368_v54, -inf }
 0x43c   : > { %v2261_v58 = vpop.f32.mrb[1].mxu1  ;;  %1377 = vmax.xlane.f32.xlu1 %v1376_v57  ;;  %v1371_v59 = vpop.f32.mrb[6].mxu0  ;;  %v1505_v61 = vsel %vm1375_vm1, %v1498_v56, -inf }
 0x43d   : > { %1506 = vmax.xlane.f32.xlu0 %v1505_v61  ;;  %v2246_v62 = vpop.f32.mrb[7].mxu0  ;;  %v1501_v63 = vpop.f32.mrb[2].mxu1  ;;  %v1379_v1 = vsel %vm1375_vm1, %v1371_v59, -inf }
 0x43e   : > { %v2262_v0 = vpop.f32.mrb[3].mxu1  ;;  %v1508_v2 = vsel %vm1375_vm1, %v1501_v63, -inf }
 0x440   : > { %1380 = vmax.xlane.f32.xlu1 %v1379_v1 }
 0x441   : > { %1509 = vmax.xlane.f32.xlu0 %v1508_v2 }
 0x4c9   : > { %v1378_v7 = vpop.xlane.xlu1 %1377 }
 0x4ca   : > { %v1382_v8 = vsub.f32 %v1368_v54, %v1378_v7  ;;  %v1507_v9 = vpop.xlane.xlu0 %1506 }
 0x4cb   : > { %v1511_v10 = vsub.f32 %v1498_v56, %v1507_v9  ;;  %v2623_v9 = vld [vmem:[#allocation15 + $0x14] ss:$8 sps:$4 sm:$0xff]  }
 0x4cc   : > { %v1384_v11 = vmul.f32 1.442695, %v1382_v8 }
 0x4cd   : > { %v1513_v12 = vmul.f32 1.442695, %v1511_v10  ;;  %v1381_v13 = vpop.xlane.xlu1 %1380  ;;  %v2621_v10 = vld [vmem:[#allocation15 + $0x10] ss:$8 sps:$4 sm:$0xff]  }
 0x4ce   : > { %v1383_v14 = vsub.f32 %v1371_v59, %v1381_v13  ;;  %v1510_v15 = vpop.xlane.xlu0 %1509  ;;  %v2629_v13 = vld [vmem:[#allocation15 + $0x34] ss:$8 sps:$4 sm:$0xff]  }
 0x4cf   : > { %2642 = vpow2.f32 %v1513_v12  ;;  %v1512_v16 = vsub.f32 %v1501_v63, %v1510_v15  ;;  %v2624_v12 = vld [vmem:[#allocation15 + $0x20] ss:$8 sps:$4 sm:$0xff]   ;;  %v2632_v15 = vld [vmem:[#allocation15 + $0x44] ss:$8 sps:$4 sm:$0xff]  }
 0x4d0   : > { %v1386_v17 = vmul.f32 1.442695, %v1383_v14  ;;  %2644 = vpow2.f32 %v1384_v11  ;;  %v2626_v11 = vld [vmem:[#allocation15 + $0x24] ss:$8 sps:$4 sm:$0xff]   ;;  %v2627_v14 = vld [vmem:[#allocation15 + $0x30] ss:$8 sps:$4 sm:$0xff]  }
 0x4d1   : > { %v1515_v18 = vmul.f32 1.442695, %v1512_v16  ;;  %v2630_v16 = vld [vmem:[#allocation15 + $0x40] ss:$8 sps:$4 sm:$0xff]  }
 0x4d2   : > { %2646 = vpow2.f32 %v1386_v17  ;;  %v2635_v17 = vld [vmem:[#allocation15 + $0x54] ss:$8 sps:$4 sm:$0xff]  }
 0x4d3   : > { %2648 = vpow2.f32 %v1515_v18  ;;  %v2633_v18 = vld [vmem:[#allocation15 + $0x50] ss:$8 sps:$4 sm:$0xff]  }
 0x4d9   : > { %v2643_v60 = vpop.eup %2642 }
 0x4da   : > { %v1517_v19 = vsel %vm1375_vm1, %v2643_v60, 0.0  ;;  %v2645_v20 = vpop.eup %2644 }
 0x4db   : > { %1518 = vadd.xlane.f32.xlu0 %v1517_v19  ;;  %v1388_v24 = vsel %vm1375_vm1, %v2645_v20, 0.0  ;;  %v2636_v19 = vld [vmem:[#allocation15 + $0x60] ss:$8 sps:$4 sm:$0xff]  }
 0x4dc   : > { %v2647_v21 = vpop.eup %2646 }
 0x4dd   : > { %v2649_v22 = vpop.eup %2648  ;;  %v1394_v23 = vpack.c.bf16 %v2647_v21, %v2645_v20  ;;  %v1391_v27 = vsel %vm1375_vm1, %v2647_v21, 0.0  ;;  %v2641_v20 = vld [vmem:[#allocation15 + $0x74] ss:$8 sps:$4 sm:$0xff]   ;;  %v2639_v21 = vld [vmem:[#allocation15 + $0x70] ss:$8 sps:$4 sm:$0xff]  }
 0x4de   : > { %v1520_v25 = vsel %vm1375_vm1, %v2649_v22, 0.0  ;;  %v1523_v26 = vpack.c.bf16 %v2649_v22, %v2643_v60  ;;  %v2638_v60 = vld [vmem:[#allocation15 + $0x64] ss:$8 sps:$4 sm:$0xff]  }
 0x4df   : > { %1389 = vadd.xlane.f32.xlu0 %v1388_v24  ;;  %1521 = vadd.xlane.f32.xlu1 %v1520_v25  ;;  %v2215_v22 = vld [vmem:[%s3703_s12 + $0x3] ss:$4 sm:$0x3]  ;;  %s2866_s12 = scalar_lea.vmem %s2865_s3, 1024 }
 0x4e0   : > { %2252 = vmatmul.mubr.msk.bf16.vlgmr.msra.gmra.mrb[8].mxu0 %vm1375_vm1, %v1394_v23  ;;  %2268 = vmatmul.mubr.msk.bf16.vlgmr.msra.gmra.mrb[4].mxu1 %vm1375_vm1, %v1523_v26  ;;  %v1841_v23 = vrot.slane %v2215_v22, %v1103_v35  ;;  %v1845_v24 = vrot.slane %v2215_v22, %v1107_v37  ;;  %p2868_p7 = scmp.lt.s32.totalorder %s2866_s12, %s2860_s27 }
 0x4e1   : > { %1670 = vmatpush1.bf16.msra.mxu1 %v2594_v28  ;;  %1701 = vmatprep.mubr.bf16.mxu1 %v3007_v48 }
 0x4e2   : > { %1671 = vmatprep.subr.bf16.mxu1 %v2599_v30  ;;  %p2869_p2 = por %p2868_p7, %p2867_p9 }
 0x4e3   : > { %1392 = vadd.xlane.f32.xlu1 %v1391_v27 }
 0x4e4   : > { %p2870_p10 = pnand %p2869_p2, %p2863_p8 }
 0x4e5   : > { %1672 = vmatpush1.bf16.msra.mxu1 %v2597_v31 }
 0x4e6   : > { %1673 = vmatprep.subr.bf16.mxu1 %v2602_v32 }
 0x4e9   : > { %1674 = vmatpush1.bf16.msra.mxu1 %v2600_v33 }
 0x4ea   : > { %1675 = vmatprep.subr.bf16.mxu1 %v2605_v36 }
 0x4ed   : > { %1676 = vmatpush1.bf16.msra.mxu1 %v2603_v38 }
 0x4ee   : > { %1677 = vmatprep.subr.bf16.mxu1 %v2608_v39 }
 0x4f1   : > { %1678 = vmatpush1.bf16.msra.mxu1 %v2606_v40 }
 0x4f2   : > { %1679 = vmatprep.subr.bf16.mxu1 %v2611_v41 }
 0x4f5   : > { %1680 = vmatpush1.bf16.msra.mxu1 %v2609_v42 }
 0x4f6   : > { %1681 = vmatprep.subr.bf16.mxu1 %v2614_v43 }
 0x4f9   : > { %1682 = vmatpush1.bf16.msra.mxu1 %v2612_v44 }
 0x4fa   : > { %1683 = vmatprep.subr.bf16.mxu1 %v2617_v45 }
 0x4fd   : > { %1684 = vmatpush1.bf16.msra.mxu1 %v2615_v46 }
 0x4fe   : > { %1792 = vmatprep.subr.bf16.mxu1 %v2620_v47 }
 0x568   : > { %v1519_v49 = vpop.xlane.xlu0 %1518 }
 0x569   : > { %2650 = vrcp.f32 %v1519_v49 }
 0x56c   : > { %v1522_v50 = vpop.xlane.xlu1 %1521  ;;  %v1390_v51 = vpop.xlane.xlu0 %1389 }
 0x56d   : > { %2652 = vrcp.f32 %v1390_v51 }
 0x56e   : > { %2654 = vrcp.f32 %v1522_v50 }
 0x570   : > { %v1393_v52 = vpop.xlane.xlu1 %1392 }
 0x571   : > { %2656 = vrcp.f32 %v1393_v52 }
 0x573   : > { %v2651_v53 = vpop.eup %2650 }
 0x577   : > { %v2653_v54 = vpop.eup %2652 }
 0x578   : > { %v2655_v57 = vpop.eup %2654 }
 0x57b   : > { %v2657_v61 = vpop.eup %2656 }
 0x5b3   : > { %v1432_v55 = vpop.f32.mrb[8].mxu0  ;;  %v1561_v56 = vpop.f32.mrb[4].mxu1 }
 0x5b4   : > { %v2253_v58 = vpop.f32.mrb[9].mxu0  ;;  %v2269_v59 = vpop.f32.mrb[5].mxu1  ;;  %v1441_v0 = vmul.f32 %v2653_v54, %v1432_v55  ;;  %v1570_v1 = vmul.f32 %v2651_v53, %v1561_v56 }
 0x5b5   : > { %v1435_v62 = vpop.f32.mrb[10].mxu0  ;;  %v1564_v63 = vpop.f32.mrb[6].mxu1 }
 0x5b6   : > { %v1442_v2 = vmul.f32 %v2657_v61, %v1435_v62  ;;  %v2254_v3 = vpop.f32.mrb[11].mxu0  ;;  %v1571_v4 = vmul.f32 %v2655_v57, %v1564_v63  ;;  %v2270_v5 = vpop.f32.mrb[7].mxu1 }
 0x5b8   : > { %v1443_v7 = vpack.c.bf16 %v1442_v2, %v1441_v0  ;;  %v1572_v8 = vpack.c.bf16 %v1571_v4, %v1570_v1 }
 0x5ba   : > { %1702 = vmatmul.mubr.bf16.vlgmr.msra.gmra.mrb[8].mxu1 %v1572_v8 }
 0x5bb   : > { %1793 = vmatpush1.bf16.msra.mxu1 %v2618_v6  ;;  %1824 = vmatprep.mubr.bf16.mxu1 %v3007_v48 }
 0x5bc   : > { %1794 = vmatprep.subr.bf16.mxu1 %v2623_v9 }
 0x5bf   : > { %1795 = vmatpush1.bf16.msra.mxu1 %v2621_v10 }
 0x5c0   : > { %1796 = vmatprep.subr.bf16.mxu1 %v2626_v11 }
 0x5c3   : > { %1797 = vmatpush1.bf16.msra.mxu1 %v2624_v12 }
 0x5c4   : > { %1798 = vmatprep.subr.bf16.mxu1 %v2629_v13 }
 0x5c7   : > { %1799 = vmatpush1.bf16.msra.mxu1 %v2627_v14 }
 0x5c8   : > { %1800 = vmatprep.subr.bf16.mxu1 %v2632_v15 }
 0x5cb   : > { %1801 = vmatpush1.bf16.msra.mxu1 %v2630_v16 }
 0x5cc   : > { %1802 = vmatprep.subr.bf16.mxu1 %v2635_v17 }
 0x5cf   : > { %1803 = vmatpush1.bf16.msra.mxu1 %v2633_v18 }
 0x5d0   : > { %1804 = vmatprep.subr.bf16.mxu1 %v2638_v60 }
 0x5d3   : > { %1805 = vmatpush1.bf16.msra.mxu1 %v2636_v19 }
 0x5d4   : > { %1806 = vmatprep.subr.bf16.mxu1 %v2641_v20 }
 0x5d7   : > { %1807 = vmatpush1.bf16.msra.mxu1 %v2639_v21 }
 0x5da   : > { %1825 = vmatmul.mubr.bf16.vlgmr.msra.gmra.mrb[8].mxu1 %v1443_v7 }
 0x6ad   : > { %v1826_v25 = vpop.f32.mrb[8].mxu1 }
 0x6ae   : > { %v1848_v26 = vadd.f32 %v1841_v23, %v1826_v25  ;;  %v1828_v27 = vpop.f32.mrb[9].mxu1 }
 0x6af   : > { %v1849_v28 = vadd.f32 %v1845_v24, %v1828_v27  ;;  %v1830_v29 = vpop.f32.mrb[10].mxu1 }
 0x6b0   : > { %1852 = vst [vmem:[%s3464_s23] sm:$0xff] %v1848_v26  ;;  %v1850_v30 = vadd.f32 %v1841_v23, %v1830_v29  ;;  %v1832_v31 = vpop.f32.mrb[11].mxu1 }
 0x6b1   : > { %1853 = vst [vmem:[%s3464_s23 + $0x8] sm:$0xff] %v1849_v28  ;;  %v1851_v34 = vadd.f32 %v1845_v24, %v1832_v31 }
 0x6b2   : > { %1854 = vst [vmem:[%s3464_s23 + $0x10] sm:$0xff] %v1850_v30 }
 0x6b3   : > { %1855 = vst [vmem:[%s3464_s23 + $0x18] sm:$0xff] %v1851_v34 }
 0x6b4   : > { %2873 = shalt.err (!%p2870_p10)
}
 0x6b5   : > { %s2874_s23 = scalar_lea.hbm %s3534_s4, 512  ;;  %s2878_s22 = scalar_lea.hbm %s3706_s0, 2048 }
 0x6b6   : > { %p2875_p3 = scmp.ne.s32.totalorder %s3534_s4, %s2874_s23  ;;  %p2879_p12 = scmp.lt.u32.totalorder %s3534_s4, %s3706_s0 }
 0x6b7   : > { %p2880_p11 = scmp.lt.u32.totalorder %s2878_s22, %s2874_s23  ;;  %p2882_p4 = scmp.lt.u32.totalorder %s2874_s23, %s3534_s4 }
 0x6b8   : > { %p2876_p5 = pnand %p2875_p3, %p3707_p1 }
 0x6b9   : > { %p2881_p13 = por %p2880_p11, %p2879_p12 }
 0x6ba   : > { %p2877_p6 = pneg %p2876_p5 }
 0x6bb   : > { %p2883_p0 = por %p2882_p4, %p2881_p13 }
 0x6bd   : > { %p2884_p8 = pnand %p2883_p0, %p2877_p6 }
 0x6bf   : > { %2887 = shalt.err (!%p2884_p8)
}
 0x6c0   : > { %s3009_s6 = smov 256   ;;  %s3010_s21 = smov 16  }
 0x6c1   : > { %2297 = dma.vmem_to_hbm [thread:$0]  (%p3707_p1), %s3536_s7, 512, %s3534_s4, %s1857_s1, %s3009_s6, %s3009_s6, %s3010_s21  }
 0x6c2 PF: > { %s3708_s20 = sld [smem:[#allocation24_spill]]  ;;  %s3709_s18 = sld [smem:[#allocation31_spill]] }
 0x6c3   : > { %p2335_p9 = scmp.ge.s32.totalorder %s2994_s15, 2 }
 0x6c8   : > { %s1888_s16 = sand.u32 1, %s3708_s20   ;;  %p3710_p7 = scmp.ne.s32.totalorder %s3709_s18, 0 }
 0x6c9   : > { %s1889_s27 = scalar_lea.sflag [#allocation6], %s1888_s16 }
 0x6ca   : > { %p2323_p2 = pnand %p2335_p9, %p3710_p7 }
 0x6cc   : > { %2949 = dma.done.wait (!%p2323_p2), %s1889_s27, 512  }
 0x6cd   : > { %2951 = vsyncadd (!%p2323_p2), %s1889_s27, 4294966784  ;;  %s29_s15 = sadd.s32 1, %s2994_s15   ;;  %s3711_s27 = sld [smem:[#allocation22_spill]] }
 0x6ce   : > { %p26_p10 = scmp.ge.s32.totalorder %s29_s15, 6   ;;  %s3712_s29 = sld [smem:[#allocation23_spill]] }
 0x6cf   : > { %s3713_s3 = smov %s3731_s28  ;;  %s3714_s25 = sld [smem:[#allocation30_spill]] }
 0x6d0   : > { %s3717_s30 = smov %s2970_s9  ;;  %s3718_s9 = smov %s2974_s10 }
 0x6d1   : > { %s3719_s10 = smov %s3352_s26  ;;  %s3720_s11 = smov %s2986_s13 }
 0x6d2   : > { %s3721_s12 = smov %s2990_s14  ;;  %s3723_s14 = smov %s3729_s5 }
 0x6d3   :  { %28 = sbr.rel (!%p26_p10) target bundleno = 22 (0x16), region = 144 }
 0x6d4   : > { %s3715_s28 = smov %s3712_s29  ;;  %s3716_s29 = smov %s3713_s3 }
 0x6d5   : > { %s3722_s13 = smov %s3714_s25 }
 0x6da   :  { %1894 = vsyncpa [#allocation5], 1 }
 0x6db   :  { %1896 = vsyncpa [#allocation5 + $0x1], 1 }
 0x6dc   :  { %1897 = vsyncpa [#allocation8], 1 }
 0x6dd   :  { %1899 = vsyncpa [#allocation8 + $0x1], 1 }
 0x6de   :  { %1900 = vsyncpa [#allocation11], 1 }
 0x6df   :  { %1901 = vsyncpa [#allocation14], 1 }
 0x6e0   :  { %1902 = vsyncpa [#allocation6], 1 }
 0x6e1   :  { %1904 = vsyncpa [#allocation6 + $0x1], 1 }

</bundles_post_ra>
